<compile_context>
chip_gen: v7x
topology: tpu7x:2x2x1
jax: 0.10.0
libtpu: 0.0.40
codegen_flags: <defaults>
</compile_context>

<pallas_src>
import functools

import jax
import jax.numpy as jnp
from jax import lax
from jax.experimental import pallas as pl
from jax.experimental.pallas import tpu as pltpu

_EPS = 1e-8  # torch.nn.CosineSimilarity default eps


def _imaginarium_kernel(x_img_ref, x_txt_ref, y_ref, out_ref, *, c_pad):
    # Load once, upcast to f32 for all math (v5e-safe; bf16 only saves HBM BW).
    xi = x_img_ref[...].astype(jnp.float32)        # [Bb, C, D]
    xt = x_txt_ref[...].astype(jnp.float32)        # [Bb, W, D]
    y = y_ref[...].astype(jnp.float32)             # [Bb, C]

    bb, num_c, _ = xi.shape

    # ---- torch.argmax(y, dim=1), first-max tie-break -> one-hot selector ----
    y_max = jnp.max(y, axis=1, keepdims=True)                                  # [Bb,1]
    c_iota = lax.broadcasted_iota(jnp.int32, (bb, num_c), 1)                   # [Bb,C]
    idx = jnp.min(jnp.where(y == y_max, c_iota, num_c), axis=1, keepdims=True)
    sel = (c_iota == idx).astype(jnp.float32)[:, None, :]                      # [Bb,1,C]

    # ---- gather chosen image embedding (batched MXU contraction over cards) ----
    chosen = jnp.einsum('bqc,bcd->bqd', sel, xi,
                        preferred_element_type=jnp.float32)                    # [Bb,1,D]

    # ---- CosineSimilarity(dim=2)(chosen repeated over words, x_txt) ----
    dot_w = jnp.einsum('bqd,bwd->bqw', chosen, xt,
                       preferred_element_type=jnp.float32)                     # [Bb,1,W]
    sq_img = jnp.sum(chosen * chosen, axis=-1, keepdims=True)                  # [Bb,1,1]
    sq_txt = jnp.sum(xt * xt, axis=-1)[:, None, :]                             # [Bb,1,W]
    # dot / max(||a||*||b||, eps)  ==  dot * rsqrt(max(||a||^2*||b||^2, eps^2))
    logits_w = dot_w * lax.rsqrt(jnp.maximum(sq_img * sq_txt, _EPS * _EPS))

    # ---- torch.nn.Softmax() on 2-D input == softmax over dim=1 (words) ----
    # TODO(synk): gumbel_softmax(hard=True) branch (params['gumbel']=True) not
    # implemented; the reference gumbel helper was not provided.
    m_w = jnp.max(logits_w, axis=-1, keepdims=True)
    e_w = jnp.exp(logits_w - m_w)
    w_words = e_w * pl.reciprocal(jnp.sum(e_w, axis=-1, keepdims=True),
                                  approx=True)                                 # [Bb,1,W]

    # ---- weighted sum of word embeddings (the mul/permute/sum in forward) ----
    fw = jnp.einsum('bqw,bwd->bqd', w_words, xt,
                    preferred_element_type=jnp.float32)                        # [Bb,1,D]

    # ---- CosineSimilarity(dim=2)(final_words repeated over cards, x_img) ----
    dot_c = jnp.einsum('bqd,bcd->bqc', fw, xi,
                       preferred_element_type=jnp.float32)                     # [Bb,1,C]
    sq_fw = jnp.sum(fw * fw, axis=-1, keepdims=True)                           # [Bb,1,1]
    sq_xi = jnp.sum(xi * xi, axis=-1)[:, None, :]                              # [Bb,1,C]
    logits_f = (dot_c * lax.rsqrt(jnp.maximum(sq_fw * sq_xi,
                                              _EPS * _EPS)))[:, 0, :]          # [Bb,C]

    # ---- final softmax over cards ----
    m_f = jnp.max(logits_f, axis=-1, keepdims=True)
    e_f = jnp.exp(logits_f - m_f)
    probs = e_f * pl.reciprocal(jnp.sum(e_f, axis=-1, keepdims=True),
                                approx=True)                                   # [Bb,C]

    if c_pad == num_c:
        out_ref[...] = probs
    else:
        # Lane-dense store: embed [Bb,C] into [Bb,c_pad] with a tiny identity-
        # embed matmul (padded lanes are exact zeros); avoids masked vst.msk.
        emb = (lax.broadcasted_iota(jnp.int32, (num_c, c_pad), 0) ==
               lax.broadcasted_iota(jnp.int32, (num_c, c_pad), 1)
               ).astype(jnp.float32)                                           # [C,c_pad]
        out_ref[...] = jnp.dot(probs, emb, preferred_element_type=jnp.float32)


def imaginarium_forward(x_img, x_txt, y, *, b_blk=None):
    """Runs ImaginariumModelBaseLine.forward as a Pallas TPU kernel.

    x_img: [B, C, D] (f32 or bf16), x_txt: [B, W, D] (f32 or bf16), y: [B, C].
    Returns softmax-over-cards probabilities, [B, C] float32.
    """
    B, C, D = x_img.shape
    Bt, W, Dt = x_txt.shape
    assert (Bt, Dt) == (B, D) and y.shape == (B, C)

    if b_blk is None:  # biggest batch tile that divides B (blocks are tiny here)
        b_blk = next((c for c in (256, 128, 64, 32, 16, 8) if B % c == 0), B)
    assert B % b_blk == 0, (B, b_blk)
    grid = (B // b_blk,)

    c_pad = ((C + 127) // 128) * 128  # lane-dense output slab width

    # Advisory cost hint so XLA schedules around the custom call sensibly.
    flops = int(2 * B * D * (2 * C + 2 * W)        # four batched contractions
                + 2 * B * D * (C + W + 2)          # sum-of-squares norms
                + 2 * B * C * c_pad)               # lane-pad embed matmul
    transcendentals = int(B * (2 * (W + C) + 4))   # exp + rsqrt + reciprocals
    bytes_accessed = int(x_img.size * x_img.dtype.itemsize
                         + x_txt.size * x_txt.dtype.itemsize
                         + y.size * y.dtype.itemsize
                         + B * c_pad * 4)

    out_pad = pl.pallas_call(
        functools.partial(_imaginarium_kernel, c_pad=c_pad),
        out_shape=jax.ShapeDtypeStruct((B, c_pad), jnp.float32),
        grid=grid,
        in_specs=[
            pl.BlockSpec((b_blk, C, D), lambda i: (i, 0, 0)),
            pl.BlockSpec((b_blk, W, D), lambda i: (i, 0, 0)),
            pl.BlockSpec((b_blk, C), lambda i: (i, 0)),
        ],
        out_specs=pl.BlockSpec((b_blk, c_pad), lambda i: (i, 0)),
        compiler_params=pltpu.CompilerParams(
            dimension_semantics=("parallel",),       # shard batch across TCs (v7x)
            vmem_limit_bytes=32 * 1024 * 1024),
        cost_estimate=pl.CostEstimate(flops=flops,
                                      transcendentals=transcendentals,
                                      bytes_accessed=bytes_accessed),
    )(x_img, x_txt, y)
    return out_pad[:, :C]


def _reference(x_img, x_txt, y):
    """Pure-JAX (f32) mirror of the PyTorch forward for validation."""
    x_img = x_img.astype(jnp.float32)
    x_txt = x_txt.astype(jnp.float32)
    y = y.astype(jnp.float32)

    def cos(a, b, axis):
        dot = jnp.sum(a * b, axis=axis)
        na = jnp.sqrt(jnp.sum(a * a, axis=axis))
        nb = jnp.sqrt(jnp.sum(b * b, axis=axis))
        return dot / jnp.maximum(na * nb, _EPS)

    idx = jnp.argmax(y, axis=1)
    chosen = jnp.take_along_axis(x_img, idx[:, None, None], axis=1)[:, 0, :]
    logits_w = cos(chosen[:, None, :], x_txt, axis=2)
    w = jax.nn.softmax(logits_w, axis=1)
    fw = jnp.sum(w[:, :, None] * x_txt, axis=1)
    logits_f = cos(fw[:, None, :], x_img, axis=2)
    return jax.nn.softmax(logits_f, axis=1)


if __name__ == "__main__":
    params = {"num_cards": 4, "num_words": 8, "gumbel": False}
    B, D = 32, 128
    C, W = params["num_cards"], params["num_words"]

    key = jax.random.PRNGKey(0)
    k1, k2, k3 = jax.random.split(key, 3)
    # bf16 storage (halves HBM traffic on v6e/v7x); kernel upcasts to f32.
    x_img = jax.random.normal(k1, (B, C, D), dtype=jnp.float32).astype(jnp.bfloat16)
    x_txt = jax.random.normal(k2, (B, W, D), dtype=jnp.float32).astype(jnp.bfloat16)
    choice = jax.random.randint(k3, (B,), 0, C)
    y = jax.nn.one_hot(choice, C, dtype=jnp.float32)

    out = jax.block_until_ready(imaginarium_forward(x_img, x_txt, y, b_blk=8))

    ref = _reference(x_img, x_txt, y)
    assert out.shape == (B, C), out.shape
    assert bool(jnp.all(jnp.isfinite(out))), "non-finite output"
    # Tolerance covers the approx EUP reciprocal in the softmax denominators
    # and MXU accumulation-order differences vs the elementwise f32 reference.
    assert jnp.allclose(out, ref, atol=5e-3, rtol=5e-3), (out, ref)
    print("KERNEL_OK")
</pallas_src>

<mosaic_0001>
module attributes {stable_mosaic.version = 11 : i64} {
  func.func @_imaginarium_kernel(%arg0: i32, %arg1: memref<8x4x128xbf16, #tpu.memory_space<vmem>>, %arg2: memref<8x8x128xbf16, #tpu.memory_space<vmem>>, %arg3: memref<8x4xf32, #tpu.memory_space<vmem>>, %arg4: memref<8x128xf32, #tpu.memory_space<vmem>>) attributes {dimension_semantics = [#tpu.dimension_semantics<parallel>], iteration_bounds = array<i64: 4>, scalar_prefetch = 0 : i64, scratch_operands = 0 : i64, tpu.core_type = #tpu.core_type<tc>, window_params = [{transform_indices = @transform_0, window_bounds = array<i64: 8, 4, 128>}, {transform_indices = @transform_1, window_bounds = array<i64: 8, 8, 128>}, {transform_indices = @transform_2, window_bounds = array<i64: 8, 4>}, {transform_indices = @transform_3, window_bounds = array<i64: 8, 128>}]} {
    %c0 = arith.constant 0 : index
    %c0_0 = arith.constant 0 : index
    %c0_1 = arith.constant 0 : index
    %0 = vector.load %arg1[%c0, %c0_0, %c0_1] : memref<8x4x128xbf16, #tpu.memory_space<vmem>>, vector<8x4x128xbf16>
    %1 = arith.extf %0 : vector<8x4x128xbf16> to vector<8x4x128xf32>
    %c0_2 = arith.constant 0 : index
    %c0_3 = arith.constant 0 : index
    %c0_4 = arith.constant 0 : index
    %2 = vector.load %arg2[%c0_2, %c0_3, %c0_4] : memref<8x8x128xbf16, #tpu.memory_space<vmem>>, vector<8x8x128xbf16>
    %3 = arith.extf %2 : vector<8x8x128xbf16> to vector<8x8x128xf32>
    %c0_5 = arith.constant 0 : index
    %c0_6 = arith.constant 0 : index
    %4 = vector.load %arg3[%c0_5, %c0_6] : memref<8x4xf32, #tpu.memory_space<vmem>>, vector<8x4xf32>
    %cst = arith.constant dense<0xFF800000> : vector<8xf32>
    %5 = vector.multi_reduction <maximumf>, %4, %cst [1] : vector<8x4xf32> to vector<8xf32>
    %6 = vector.shape_cast %5 : vector<8xf32> to vector<8x1xf32>
    %7 = tpu.iota {dimensions = array<i32: 1>} : vector<8x4xi32>
    %8 = vector.broadcast %6 : vector<8x1xf32> to vector<8x4xf32>
    %9 = arith.cmpf oeq, %4, %8 : vector<8x4xf32>
    %c4_i32 = arith.constant 4 : i32
    %10 = vector.broadcast %c4_i32 : i32 to vector<8x4xi32>
    %11 = arith.select %9, %7, %10 : vector<8x4xi1>, vector<8x4xi32>
    %cst_7 = arith.constant dense<2147483647> : vector<8xi32>
    %12 = vector.multi_reduction <minsi>, %11, %cst_7 [1] : vector<8x4xi32> to vector<8xi32>
    %13 = vector.shape_cast %12 : vector<8xi32> to vector<8x1xi32>
    %14 = vector.broadcast %13 : vector<8x1xi32> to vector<8x4xi32>
    %15 = arith.cmpi eq, %7, %14 : vector<8x4xi32>
    %16 = arith.extui %15 : vector<8x4xi1> to vector<8x4xi32>
    %17 = arith.sitofp %16 : vector<8x4xi32> to vector<8x4xf32>
    %18 = vector.shape_cast %17 : vector<8x4xf32> to vector<8x1x4xf32>
    "tpu.trace_start"() <{level = 10 : i32, message = "bqc,bcd->bqd"}> : () -> ()
    %cst_8 = arith.constant dense<0.000000e+00> : vector<8x1x128xf32>
    %19 = tpu.matmul %18, %1, %cst_8 {dimension_numbers = #tpu.dot_dimension_numbers<[2], [1], [1], [2], [0, 0, 0, 1, 1, 2], [0], [0]>} : vector<8x1x4xf32>, vector<8x4x128xf32>, vector<8x1x128xf32> -> vector<8x1x128xf32>
    "tpu.trace_stop"() : () -> ()
    "tpu.trace_start"() <{level = 10 : i32, message = "bqd,bwd->bqw"}> : () -> ()
    %cst_9 = arith.constant dense<0.000000e+00> : vector<8x1x8xf32>
    %20 = tpu.matmul %19, %3, %cst_9 {dimension_numbers = #tpu.dot_dimension_numbers<[2], [2], [1], [1], [0, 0, 0, 1, 1, 1], [0], [0]>} : vector<8x1x128xf32>, vector<8x8x128xf32>, vector<8x1x8xf32> -> vector<8x1x8xf32>
    "tpu.trace_stop"() : () -> ()
    %21 = arith.mulf %19, %19 : vector<8x1x128xf32>
    %cst_10 = arith.constant dense<0.000000e+00> : vector<8x1xf32>
    %22 = vector.multi_reduction <add>, %21, %cst_10 [2] : vector<8x1x128xf32> to vector<8x1xf32>
    %23 = vector.shape_cast %22 : vector<8x1xf32> to vector<8x1x1xf32>
    %24 = arith.mulf %3, %3 : vector<8x8x128xf32>
    %cst_11 = arith.constant dense<0.000000e+00> : vector<8x8xf32>
    %25 = vector.multi_reduction <add>, %24, %cst_11 [2] : vector<8x8x128xf32> to vector<8x8xf32>
    %26 = vector.shape_cast %25 : vector<8x8xf32> to vector<8x1x8xf32>
    %27 = vector.broadcast %23 : vector<8x1x1xf32> to vector<8x1x8xf32>
    %28 = arith.mulf %27, %26 : vector<8x1x8xf32>
    %cst_12 = arith.constant 1.000000e-16 : f32
    %29 = vector.broadcast %cst_12 : f32 to vector<8x1x8xf32>
    %30 = arith.maximumf %28, %29 : vector<8x1x8xf32>
    %31 = math.rsqrt %30 : vector<8x1x8xf32>
    %32 = arith.mulf %20, %31 : vector<8x1x8xf32>
    %cst_13 = arith.constant dense<0xFF800000> : vector<8x1xf32>
    %33 = vector.multi_reduction <maximumf>, %32, %cst_13 [2] : vector<8x1x8xf32> to vector<8x1xf32>
    %34 = vector.shape_cast %33 : vector<8x1xf32> to vector<8x1x1xf32>
    %35 = vector.broadcast %34 : vector<8x1x1xf32> to vector<8x1x8xf32>
    %36 = arith.subf %32, %35 : vector<8x1x8xf32>
    %37 = math.exp %36 : vector<8x1x8xf32>
    %cst_14 = arith.constant dense<0.000000e+00> : vector<8x1xf32>
    %38 = vector.multi_reduction <add>, %37, %cst_14 [2] : vector<8x1x8xf32> to vector<8x1xf32>
    %39 = vector.shape_cast %38 : vector<8x1xf32> to vector<8x1x1xf32>
    %40 = tpu.reciprocal %39 {approx = true} : vector<8x1x1xf32> -> vector<8x1x1xf32>
    %41 = vector.broadcast %40 : vector<8x1x1xf32> to vector<8x1x8xf32>
    %42 = arith.mulf %37, %41 : vector<8x1x8xf32>
    "tpu.trace_start"() <{level = 10 : i32, message = "bqw,bwd->bqd"}> : () -> ()
    %cst_15 = arith.constant dense<0.000000e+00> : vector<8x1x128xf32>
    %43 = tpu.matmul %42, %3, %cst_15 {dimension_numbers = #tpu.dot_dimension_numbers<[2], [1], [1], [2], [0, 0, 0, 1, 1, 2], [0], [0]>} : vector<8x1x8xf32>, vector<8x8x128xf32>, vector<8x1x128xf32> -> vector<8x1x128xf32>
    "tpu.trace_stop"() : () -> ()
    "tpu.trace_start"() <{level = 10 : i32, message = "bqd,bcd->bqc"}> : () -> ()
    %cst_16 = arith.constant dense<0.000000e+00> : vector<8x1x4xf32>
    %44 = tpu.matmul %43, %1, %cst_16 {dimension_numbers = #tpu.dot_dimension_numbers<[2], [2], [1], [1], [0, 0, 0, 1, 1, 1], [0], [0]>} : vector<8x1x128xf32>, vector<8x4x128xf32>, vector<8x1x4xf32> -> vector<8x1x4xf32>
    "tpu.trace_stop"() : () -> ()
    %45 = arith.mulf %43, %43 : vector<8x1x128xf32>
    %cst_17 = arith.constant dense<0.000000e+00> : vector<8x1xf32>
    %46 = vector.multi_reduction <add>, %45, %cst_17 [2] : vector<8x1x128xf32> to vector<8x1xf32>
    %47 = vector.shape_cast %46 : vector<8x1xf32> to vector<8x1x1xf32>
    %48 = arith.mulf %1, %1 : vector<8x4x128xf32>
    %cst_18 = arith.constant dense<0.000000e+00> : vector<8x4xf32>
    %49 = vector.multi_reduction <add>, %48, %cst_18 [2] : vector<8x4x128xf32> to vector<8x4xf32>
    %50 = vector.shape_cast %49 : vector<8x4xf32> to vector<8x1x4xf32>
    %51 = vector.broadcast %47 : vector<8x1x1xf32> to vector<8x1x4xf32>
    %52 = arith.mulf %51, %50 : vector<8x1x4xf32>
    %cst_19 = arith.constant 1.000000e-16 : f32
    %53 = vector.broadcast %cst_19 : f32 to vector<8x1x4xf32>
    %54 = arith.maximumf %52, %53 : vector<8x1x4xf32>
    %55 = math.rsqrt %54 : vector<8x1x4xf32>
    %56 = arith.mulf %44, %55 : vector<8x1x4xf32>
    %57 = vector.shape_cast %56 : vector<8x1x4xf32> to vector<8x4xf32>
    %cst_20 = arith.constant dense<0xFF800000> : vector<8xf32>
    %58 = vector.multi_reduction <maximumf>, %57, %cst_20 [1] : vector<8x4xf32> to vector<8xf32>
    %59 = vector.shape_cast %58 : vector<8xf32> to vector<8x1xf32>
    %60 = vector.broadcast %59 : vector<8x1xf32> to vector<8x4xf32>
    %61 = arith.subf %57, %60 : vector<8x4xf32>
    %62 = math.exp %61 : vector<8x4xf32>
    %cst_21 = arith.constant dense<0.000000e+00> : vector<8xf32>
    %63 = vector.multi_reduction <add>, %62, %cst_21 [1] : vector<8x4xf32> to vector<8xf32>
    %64 = vector.shape_cast %63 : vector<8xf32> to vector<8x1xf32>
    %65 = tpu.reciprocal %64 {approx = true} : vector<8x1xf32> -> vector<8x1xf32>
    %66 = vector.broadcast %65 : vector<8x1xf32> to vector<8x4xf32>
    %67 = arith.mulf %62, %66 : vector<8x4xf32>
    %68 = tpu.iota {dimensions = array<i32: 0>} : vector<4x128xi32>
    %69 = tpu.iota {dimensions = array<i32: 1>} : vector<4x128xi32>
    %70 = arith.cmpi eq, %68, %69 : vector<4x128xi32>
    %71 = arith.extui %70 : vector<4x128xi1> to vector<4x128xi32>
    %72 = arith.sitofp %71 : vector<4x128xi32> to vector<4x128xf32>
    %cst_22 = arith.constant dense<0.000000e+00> : vector<8x128xf32>
    %73 = tpu.matmul %67, %72, %cst_22 {dimension_numbers = #tpu.dot_dimension_numbers<[1], [0], [0], [1], [0, 0, 1, 1], [], []>} : vector<8x4xf32>, vector<4x128xf32>, vector<8x128xf32> -> vector<8x128xf32>
    %c0_23 = arith.constant 0 : index
    %c0_24 = arith.constant 0 : index
    %74 = vector.load %arg4[%c0_23, %c0_24] : memref<8x128xf32, #tpu.memory_space<vmem>>, vector<8x128xf32>
    tpu.vector_store %arg4[%c0_23, %c0_24], %73 {strides = array<i32>} : memref<8x128xf32, #tpu.memory_space<vmem>>, vector<8x128xf32>,
    return
  }
  func.func @transform_0(%arg0: i32) -> (i32, i32, i32) {
    %c0_i32 = arith.constant 0 : i32
    %c0_i32_0 = arith.constant 0 : i32
    %c0_i32_1 = arith.constant 0 : i32
    return %arg0, %c0_i32, %c0_i32_0 : i32, i32, i32
  }
  func.func @transform_1(%arg0: i32) -> (i32, i32, i32) {
    %c0_i32 = arith.constant 0 : i32
    %c0_i32_0 = arith.constant 0 : i32
    %c0_i32_1 = arith.constant 0 : i32
    return %arg0, %c0_i32, %c0_i32_0 : i32, i32, i32
  }
  func.func @transform_2(%arg0: i32) -> (i32, i32) {
    %c0_i32 = arith.constant 0 : i32
    %c0_i32_0 = arith.constant 0 : i32
    return %arg0, %c0_i32 : i32, i32
  }
  func.func @transform_3(%arg0: i32) -> (i32, i32) {
    %c0_i32 = arith.constant 0 : i32
    %c0_i32_0 = arith.constant 0 : i32
    return %arg0, %c0_i32 : i32, i32
  }
}

</mosaic_0001>

<bundles_post_ra>
// kernel: tpu_custom_call.1
= control target key start
LH: loop header
LB: loop body
LE: loop exit
PB: predicated region body
PF: predicated region fallthrough
CT: control target
= control target key end

     0   :  { %8 = vsyncpa [#allocation3], 0  ;;  %s4558_s0 = inlined_call_operand.hbm [shape: bf16[32,4,128], index: 0, kind: input, shape index: {}]   ;;  %s4559_s1 = inlined_call_operand.hbm [shape: bf16[32,8,128], index: 1, kind: input, shape index: {}]   ;;  %s4560_s2 = inlined_call_operand.vmem [shape: f32[32,4], index: 2, kind: input, shape index: {}]   ;;  %s4561_s3 = inlined_call_operand.hbm [shape: f32[32,128], index: 3, kind: output, shape index: {}]  }
   0x1   :  { %10 = vsyncpa [#allocation3 + $0x1], 0 }
   0x2   :  { %11 = vsyncpa [#allocation6], 0 }
   0x3   :  { %13 = vsyncpa [#allocation6 + $0x1], 0 }
   0x4   :  { %14 = vsyncpa [#allocation4], 0 }
   0x5   :  { %16 = vsyncpa [#allocation4 + $0x1], 0  ;;  %s3979_s12 = smov 0   ;;  %s3981_s13 = smov 0  }
   0x6   :  { %s3983_s14 = smov 0   ;;  %s3985_s15 = smov 0  }
   0x7 LB: > { %s4000_s16 = sadd.s32 4294967295, %s3947_s15   ;;  %s3379_s17 = sadd.s32 4294967294, %s3947_s15   ;;  %s3947_s15 = sphi %s3985_s15, %s4576_s15   ;;  %s3943_s14 = sphi %s3983_s14, %s4575_s14   ;;  %s3939_s13 = sphi %s3981_s13, %s4574_s13   ;;  %s3935_s12 = sphi %s3979_s12, %s4573_s12  }
   0x8   : > { %s4004_s18 = sadd.s32 1, %s3947_s15   ;;  %s29_s19 = sadd.s32 1, %s3943_s14 }
   0x9   : > { %s26_s20 = ssub.s32 %s3947_s15, %s4004_s18  ;;  %p36_p0 = scmp.ne.s32.totalorder %s3943_s14, %s3939_s13 }
   0xa   : > { %p27_p1 = scmp.eq.s32.totalorder %s26_s20, 0  ;;  %p37_p2 = scmp.eq.s32.totalorder %s3947_s15, 0 }
   0xb   : > { %p42_p3 = scmp.ne.s32.totalorder %s3939_s13, %s3935_s12  ;;  %p43_p4 = scmp.eq.s32.totalorder %s4000_s16, 0 }
   0xc   : > { %s4016_s21 = scalar_select %p27_p1, %s3943_s14, %s29_s19  }
   0xd   : > { %p4018_p5 = por %p37_p2, %p36_p0  ;;  %p4022_p6 = por %p43_p4, %p42_p3 }
   0xe   : > { %p118_p7 = scmp.eq.s32.totalorder %s4000_s16, 3  ;;  %p124_p8 = scmp.eq.s32.totalorder %s3379_s17, 3 }
   0xf   : > { %s4565_s23 = scalar_select %p4022_p6, 1, 0 }
  0x10   : > { %p3694_p9 = scmp.lt.s32.totalorder %s3947_s15, 4  ;;  %p4028_p10 = por %p118_p7, %p36_p0 }
  0x11   : > { %p4032_p11 = por %p124_p8, %p42_p3  ;;  %s4037_s26 = sand.u32 1, %s3943_s14  }
  0x12   : > { %s4566_s24 = scalar_select %p4028_p10, 1, 0 }
  0x13   : > { %s4567_s25 = scalar_select %p4032_p11, 1, 0 }
  0x14   : > { %s3425_s27 = sshll.u32 %s3947_s15, 8  ;;  %s3382_s28 = sshll.u32 %s4037_s26, 4 }
  0x15   : > { %s4044_s4 = scalar_lea.hbm %s4558_s0, %s3425_s27  ;;  %s148_s5 = scalar_lea.vmem [#allocation2], %s3382_s28 }
  0x16   : > { %s155_s6 = sshll.u32 %s148_s5, 4  ;;  %p4048_p12 = pnand %p3694_p9, %p4018_p5  ;;  %s4052_s6 = int_to_ptr.vmem [resolvable:$true] %s155_s6 }
  0x17   : > { %s145_s8 = scalar_lea.sflag [#allocation3], %s4037_s26  ;;  %s3817_s9 = scalar_lea.hbm %s4044_s4, 256 }
  0x18   : > { %p3818_p13 = scmp.ne.s32.totalorder %s4044_s4, %s3817_s9  ;;  %p3819_p0 = pneg %p4048_p12 }
  0x19   : > { %s3822_s17 = scalar_lea.hbm %s4558_s0, 1024  ;;  %p3823_p3 = scmp.lt.u32.totalorder %s4044_s4, %s4558_s0 }
  0x1a   : > { %p3820_p1 = pnand %p3819_p0, %p3818_p13  ;;  %p3824_p4 = scmp.lt.u32.totalorder %s3822_s17, %s3817_s9 }
  0x1b   : > { %p3826_p7 = scmp.lt.u32.totalorder %s3817_s9, %s4044_s4 }
  0x1c   : > { %p3821_p2 = pneg %p3820_p1  ;;  %p3825_p5 = por %p3824_p4, %p3823_p3 }
  0x1e   : > { %p3827_p8 = por %p3826_p7, %p3825_p5 }
  0x20   : > { %p3828_p9 = pnand %p3827_p8, %p3821_p2 }
  0x22   : > { %3831 = shalt.err (!%p3828_p9)
}
  0x23   : > { %s3832_s22 = scalar_lea.vmem %s4052_s6, 256  ;;  %s3949_s27 = smov [#allocation2]  }
  0x24   : > { %p3833_p13 = scmp.ne.s32.totalorder %s4052_s6, %s3832_s22  ;;  %s3837_s28 = sshll.u32 %s3949_s27, 4  ;;  %s3838_s28 = int_to_ptr.vmem [resolvable:$false] %s3837_s28 }
  0x25   : > { %s3839_s29 = scalar_lea.vmem %s3838_s28, 512  ;;  %p3840_p10 = scmp.lt.s32.totalorder %s4052_s6, %s3838_s28 }
  0x26   : > { %p3835_p1 = pnand %p3833_p13, %p3819_p0  ;;  %p3841_p3 = scmp.lt.s32.totalorder %s3839_s29, %s3832_s22 }
  0x28   : > { %p3836_p11 = pneg %p3835_p1  ;;  %p3842_p4 = por %p3841_p3, %p3840_p10 }
  0x2a   : > { %p3843_p5 = pnand %p3842_p4, %p3836_p11 }
  0x2c   : > { %3846 = shalt.err (!%p3843_p5)
}
  0x2d   : > { %s3950_s30 = smov 32   ;;  %s3951_s5 = smov 2  }
  0x2e   : > { %3686 = dma.hbm_to_vmem [thread:$0]  (!%p4048_p12), %s4044_s4, 256, %s4052_s6, %s145_s8, %s3950_s30, %s3950_s30, %s3951_s5  }
  0x2f   : > { %p3388_p2 = scmp.ge.s32.totalorder %s3947_s15, 1  ;;  %p191_p7 = scmp.lt.s32.totalorder %s3947_s15, 5 }
  0x30   : > { %s3385_s9 = sshll.u32 %s4037_s26, 5  ;;  %s3426_s11 = sshll.u32 %s3947_s15, 9 }
  0x31   : > { %p4085_p10 = pnand %p3388_p2, %p191_p7  ;;  %s169_s17 = scalar_lea.vmem [#allocation5], %s3385_s9 }
  0x32   : > { %s176_s19 = sshll.u32 %s169_s17, 4  ;;  %s4093_s27 = scalar_lea.hbm %s4559_s1, %s3426_s11  ;;  %s4095_s19 = int_to_ptr.vmem [resolvable:$true] %s176_s19 }
  0x33   : > { %s166_s4 = scalar_lea.sflag [#allocation6], %s4037_s26  ;;  %s3847_s6 = scalar_lea.hbm %s4093_s27, 512 }
  0x34   : > { %p3848_p11 = scmp.ne.s32.totalorder %s4093_s27, %s3847_s6  ;;  %s3852_s29 = scalar_lea.hbm %s4559_s1, 2048 }
  0x35   : > { %p3853_p13 = scmp.lt.u32.totalorder %s4093_s27, %s4559_s1  ;;  %p3854_p1 = scmp.lt.u32.totalorder %s3852_s29, %s3847_s6 }
  0x36   : > { %p3850_p8 = pnand %p3848_p11, %p3819_p0  ;;  %p3856_p4 = scmp.lt.u32.totalorder %s3847_s6, %s4093_s27 }
  0x37   : > { %p3855_p3 = por %p3854_p1, %p3853_p13 }
  0x38   : > { %p3851_p9 = pneg %p3850_p8 }
  0x39   : > { %p3857_p5 = por %p3856_p4, %p3855_p3 }
  0x3b   : > { %p3858_p2 = pnand %p3857_p5, %p3851_p9 }
  0x3d   : > { %3861 = shalt.err (!%p3858_p2)
}
  0x3e   : > { %s3862_s9 = scalar_lea.vmem %s4095_s19, 512  ;;  %s3952_s11 = smov [#allocation5]  }
  0x3f   : > { %p3863_p7 = scmp.ne.s32.totalorder %s4095_s19, %s3862_s9  ;;  %s3867_s17 = sshll.u32 %s3952_s11, 4  ;;  %s3868_s17 = int_to_ptr.vmem [resolvable:$false] %s3867_s17 }
  0x40   : > { %s3869_s20 = scalar_lea.vmem %s3868_s17, 1024  ;;  %p3870_p6 = scmp.lt.s32.totalorder %s4095_s19, %s3868_s17 }
  0x41   : > { %p3865_p11 = pnand %p3863_p7, %p3819_p0  ;;  %p3871_p13 = scmp.lt.s32.totalorder %s3869_s20, %s3862_s9 }
  0x43   : > { %p3866_p8 = pneg %p3865_p11  ;;  %p3872_p1 = por %p3871_p13, %p3870_p6 }
  0x45   : > { %p3873_p3 = pnand %p3872_p1, %p3866_p8 }
  0x47   : > { %3876 = shalt.err (!%p3873_p3)
}
  0x48   : > { %s3953_s22 = smov 64   ;;  %s3954_s6 = smov 4  }
  0x49   : > { %3689 = dma.hbm_to_vmem [thread:$0]  (!%p4048_p12), %s4093_s27, 512, %s4095_s19, %s166_s4, %s3953_s22, %s3953_s22, %s3954_s6  }
  0x4a   : > { %195 = sbr.rel (%p4085_p10) target bundleno = 2284 (0x8ec), region = 32  ;;  %s4126_s8 = sand.u32 (!%p4085_p10), 1, %s3939_s13  }
  0x4b   : > { %s3389_s28 = sshll.u32 (!%p4085_p10), %s4126_s8, 4  ;;  %s198_s29 = scalar_lea.sflag (!%p4085_p10), [#allocation3], %s4126_s8 }
  0x4c   : > { %s4130_s30 = scalar_lea.vmem (!%p4085_p10), [#allocation2], %s3389_s28  ;;  %p4570_p6 = scmp.ne.s32.totalorder (!%p4085_p10), %s4565_s23, 0 }
  0x51   : > { %3922 = dma.done.wait (%p4570_p6), %s198_s29, 256  }
  0x52   : > { %3924 = vsyncadd (%p4570_p6), %s198_s29, 4294967040  ;;  %s3390_s26 = sshll.u32 %s4126_s8, 5  ;;  %s207_s7 = scalar_lea.sflag [#allocation6], %s4126_s8 }
  0x53   : > { %s4138_s10 = scalar_lea.vmem [#allocation5], %s3390_s26 }
  0x54   : > { %3926 = dma.done.wait (%p4570_p6), %s207_s7, 512  }
  0x55   : > { %3928 = vsyncadd (%p4570_p6), %s207_s7, 4294966784  ;;  %p244_p12 = scmp.lt.s32.totalorder %s4000_s16, 3  ;;  %vm281_vm0 = vcmask 31744   ;;  %v285_v2 = vlaneseq  ;;  %v3955_v9 = vmov 0.0   ;;  %v248_v14 = vld [vmem:[%s4130_s30] sm:$0x3] }
  0x56   : > { %3512 = vmatprep.subr.mxu0 %v3955_v9  ;;  %3517 = vmatprep.subr.mxu1 %v3955_v9  ;;  %v4157_v15 = vunpack.c.l.bf16 %v248_v14  ;;  %vm359_vm3 = vcmask 1043456   ;;  %v249_v16 = vld [vmem:[%s4130_s30 + $0x2] sm:$0x3]  ;;  %vm3956_vm4 = vmmov 0   ;;  %v3443_v19 = vld [vmem:[%s4138_s10 + $0x8] sm:$0xff]   ;;  %v4196_v31 = vld [vmem:[%s4138_s10 + $0x18] sm:$0xff]  }
  0x57   : > { %s245_s19 = scalar_select %p244_p12, %s4000_s16, 3  ;;  %v4150_v3 = vand.u32 127, %v285_v2  ;;  %3514 = vmatprep.mubr.msk.f32.mxu0 %vm3956_vm4, %v3955_v9  ;;  %v4164_v17 = vunpack.c.l.bf16 %v249_v16  ;;  %3519 = vmatprep.mubr.msk.f32.mxu1 %vm3956_vm4, %v3955_v9  ;;  %v3428_v18 = vld [vmem:[%s4138_s10] sm:$0xff]   ;;  %v4178_v22 = vunpack.c.l.bf16 %v3443_v19  ;;  %v4180_v23 = vunpack.c.h.bf16 %v3443_v19  ;;  %v3444_v24 = vld [vmem:[%s4138_s10 + $0x10] sm:$0xff]   ;;  %v252_v54 = vld [vmem:[%s4130_s30 + $0x8] sm:$0x3] }
  0x58   : > { %3513 = vmatpush3.msk.msra.mxu0 %vm359_vm3, %v4157_v15  ;;  %v4174_v20 = vunpack.c.l.bf16 %v3428_v18  ;;  %v4176_v21 = vunpack.c.h.bf16 %v3428_v18  ;;  %v4191_v29 = vunpack.c.l.bf16 %v3444_v24  ;;  %v4193_v30 = vunpack.c.h.bf16 %v3444_v24  ;;  %v250_v46 = vld [vmem:[%s4130_s30 + $0x4] sm:$0x3]  ;;  %v251_v50 = vld [vmem:[%s4130_s30 + $0x6] sm:$0x3]  ;;  %v253_v58 = vld [vmem:[%s4130_s30 + $0xa] sm:$0x3] }
  0x59   : > { %s3392_s27 = sshll.u32 %s245_s19, 3  ;;  %3522 = vmatprep.subr.mxu0 %v3955_v9  ;;  %3518 = vmatpush3.msk.msra.mxu1 %vm359_vm3, %v4164_v17  ;;  %v1553_v27 = vmul.f32 %v4178_v22, %v4178_v22  ;;  %v1554_v28 = vmul.f32 %v4180_v23, %v4180_v23  ;;  %v4203_v34 = vunpack.c.l.bf16 %v4196_v31  ;;  %v3957_v36 = vmov 1966171168   ;;  %v254_v61 = vld [vmem:[%s4130_s30 + $0xc] sm:$0x3]  ;;  %s3391_s23 = sshll.u32 %s4126_s8, 3 }
  0x5a   : > { %s247_s9 = scalar_lea.vmem %s4560_s2, %s3392_s27  ;;  %3527 = vmatprep.subr.mxu1 %v3955_v9  ;;  %v1551_v25 = vmul.f32 %v4174_v20, %v4174_v20  ;;  %v1552_v26 = vmul.f32 %v4176_v21, %v4176_v21  ;;  %v1555_v32 = vmul.f32 %v4191_v29, %v4191_v29  ;;  %v1556_v33 = vmul.f32 %v4193_v30, %v4193_v30  ;;  %s241_s11 = scalar_lea.vmem [#allocation7], %s3391_s23 }
  0x5b   : > { %v280_v0 = vld [vmem:[%s247_s9] sm:$0xff]  ;;  %v1557_v35 = vmul.f32 %v4203_v34, %v4203_v34  ;;  %v310_v37 = vunpack.c.l.s4 %v3957_v36  ;;  %v4207_v40 = vshrl.u32 %v285_v2, 7  ;;  %v4214_v51 = vunpack.c.l.bf16 %v250_v46  ;;  %s3274_s17 = sshll.u32 %s241_s11, 4  ;;  %s3422_s20 = sshll.u32 %s4000_s16, 7  ;;  %s4512_s17 = int_to_ptr.vmem [resolvable:$true] %s3274_s17 }
  0x5c   : > { %v282_v1 = vsel %vm281_vm0, %v280_v0, -inf  ;;  %v4217_v55 = vunpack.c.l.bf16 %v251_v50  ;;  %v4225_v59 = vunpack.c.l.bf16 %v252_v54  ;;  %v4234_v62 = vunpack.c.l.bf16 %v253_v58  ;;  %s4517_s28 = scalar_lea.hbm %s4561_s3, %s3422_s20  ;;  %s3261_s29 = scalar_lea.sflag [#allocation4], %s4126_s8 }
  0x5d   : > { %283 = vmax.xlane.f32.xlu0 %v282_v1  ;;  %v311_v39 = vunpack.c.0.s8 %v310_v37  ;;  %v255_v1 = vld [vmem:[%s4130_s30 + $0xe] sm:$0x3]  ;;  %v4243_v2 = vunpack.c.l.bf16 %v254_v61  ;;  %vm1526_vm6 = vcmask 1040384   ;;  %vm1655_vm7 = vcmask 57344   ;;  %s3877_s30 = scalar_lea.vmem %s4512_s17, 128  ;;  %p4571_p10 = scmp.ne.s32.totalorder %s4566_s24, 0 }
  0x5e   : > { %vm1744_vm8 = vcmask 64512   ;;  %vm3042_vm9 = vcmask 1041409   ;;  %vm3045_vm10 = vcmask 1042434   ;;  %vm3048_vm11 = vcmask 1043459   ;;  %p3878_p0 = scmp.ne.s32.totalorder %s4512_s17, %s3877_s30  ;;  %s3958_s16 = smov [#allocation7]  }
  0x5f   : > { %v314_v44 = vsub.s32 %v311_v39, %v4207_v40  ;;  %vm3051_vm12 = vcmask 1044484   ;;  %vm3054_vm13 = vcmask 1045509   ;;  %vm3057_vm14 = vcmask 1046534   ;;  %s3881_s26 = sshll.u32 %s3958_s16, 4  ;;  %s3882_s26 = int_to_ptr.vmem [resolvable:$false] %s3881_s26 }
  0x60   : > { %vm3060_vm15 = vcmask 1047559   ;;  %p3879_p9 = pnand %p3878_p0, %p4571_p10  ;;  %s3883_s7 = scalar_lea.vmem %s3882_s26, 256 }
  0x61   : > { %p3884_p5 = scmp.lt.s32.totalorder %s4512_s17, %s3882_s26  ;;  %p3885_p2 = scmp.lt.s32.totalorder %s3883_s7, %s3877_s30 }
  0x62   : > { %p3880_p4 = pneg %p3879_p9 }
  0x63   : > { %p3886_p7 = por %p3885_p2, %p3884_p5 }
  0x65   : > { %p3887_p11 = pnand %p3886_p7, %p3880_p4 }
  0xea   : > { %v284_v4 = vpop.xlane.xlu0 %283 }
  0xeb   : > { %vm287_vm1 = vcmp.eq.f32.partialorder %v280_v0, %v284_v4 }
  0xec   : > { %v288_v5 = vsel %vm287_vm1, %v4150_v3, 4  ;;  %vm3159_vm1 = vcmp.eq.s32.totalorder %v4207_v40, %v4150_v3 }
  0xed   : > { %v289_v6 = vsel %vm281_vm0, %v288_v5, 2147483647  ;;  %v4251_v5 = vunpack.c.l.bf16 %v255_v1 }
  0xee   : > { %v291_v7 = vshra.s32 %v289_v6, 16  ;;  %v290_v10 = vand.u32 65535, %v289_v6 }
  0xf0   : > { %v293_v8 = vcvt.s32.f32 %v291_v7  ;;  %v292_v12 = vcvt.s32.f32 %v290_v10  ;;  %v4277_v10 = vunpack.c.h.bf16 %v4196_v31 }
  0xf2   : > { %294 = vmin.xlane.f32.xlu0 %v293_v8 }
  0xf6   : > { %1561 = vadd.xlane.f32.xlu0 %v1552_v26 }
  0xfa   : > { %1565 = vadd.xlane.f32.xlu0 %v1554_v28 }
  0xfe   : > { %1569 = vadd.xlane.f32.xlu0 %v1556_v33 }
 0x17f   : > { %v295_v11 = vpop.xlane.xlu0 %294 }
 0x180   : > { %vm296_vm2 = vcmp.eq.f32.partialorder %v293_v8, %v295_v11  ;;  %v301_v38 = vcvt.f32.s32 %v295_v11  ;;  %v1558_v11 = vmul.f32 %v4277_v10, %v4277_v10 }
 0x181   : > { %v297_v13 = vsel %vm296_vm2, %v292_v12, inf }
 0x182   : > { %298 = vmin.xlane.f32.xlu1 %v297_v13  ;;  %v302_v42 = vshll.u32 %v301_v38, 16  ;;  %1573 = vadd.xlane.f32.xlu0 %v1558_v11 }
 0x186   : > { %1559 = vadd.xlane.f32.xlu1 %v1551_v25 }
 0x18a   : > { %1563 = vadd.xlane.f32.xlu1 %v1553_v27 }
 0x18e   : > { %1567 = vadd.xlane.f32.xlu1 %v1555_v32 }
 0x192   : > { %1571 = vadd.xlane.f32.xlu1 %v1557_v35 }
 0x20f   : > { %v299_v41 = vpop.xlane.xlu1 %298 }
 0x210   : > { %v300_v43 = vcvt.f32.s32 %v299_v41 }
 0x212   : > { %v303_v45 = vadd.s32 %v302_v42, %v300_v43 }
 0x214   : > { %vm304_vm5 = vcmp.eq.s32.totalorder %v4150_v3, %v303_v45 }
 0x215   : > { %v3393_v47 = vsel %vm304_vm5, 1.0, %v3955_v9 }
 0x216   : > { %v308_v48 = vcombine.high %v3393_v47, %v3393_v47  ;;  %v315_v49 = vrot.slane %v3393_v47, %v314_v44 }
 0x218   : > { %v323_v52 = vcombine.high %v315_v49, %v315_v49  ;;  %v331_v53 = vrot.slane %v315_v49, %v314_v44  ;;  %v322_v56 = vrot.slane %v308_v48, %v314_v44 }
 0x21a   : > { %3515 = vmatmul.mubr.msk.f32.vlgmr.msra.gmra.mrb[0].mxu0 %vm281_vm0, %v331_v53  ;;  %v345_v57 = vrot.slane %v323_v52, %v314_v44  ;;  %v353_v60 = vcombine.high %v331_v53, %v331_v53  ;;  %v324_v63 = vcombine.high %v322_v56, %v322_v56  ;;  %v338_v4 = vrot.slane %v322_v56, %v314_v44  ;;  %v1560_v56 = vpop.xlane.xlu1 %1559 }
 0x21b   : > { %3523 = vmatpush3.msk.msra.mxu0 %vm359_vm3, %v4214_v51  ;;  %3524 = vmatprep.mubr.msk.f32.mxu0 %vm3956_vm4, %v3955_v9 }
 0x21c   : > { %3520 = vmatmul.mubr.msk.f32.vlgmr.msra.gmra.mrb[0].mxu1 %vm281_vm0, %v345_v57  ;;  %3532 = vmatprep.subr.mxu0 %v3955_v9  ;;  %v355_v0 = vcombine.high %v345_v57, %v345_v57  ;;  %v352_v6 = vrot.slane %v324_v63, %v314_v44  ;;  %v354_v7 = vcombine.high %v338_v4, %v338_v4  ;;  %v1562_v57 = vpop.xlane.xlu0 %1561 }
 0x21d   : > { %3528 = vmatpush3.msk.msra.mxu1 %vm359_vm3, %v4217_v55  ;;  %3529 = vmatprep.mubr.msk.f32.mxu1 %vm3956_vm4, %v3955_v9 }
 0x21e   : > { %3525 = vmatmul.mubr.msk.f32.vlgmr.msra.gmra.mrb[2].mxu0 %vm281_vm0, %v353_v60  ;;  %3537 = vmatprep.subr.mxu1 %v3955_v9  ;;  %v356_v8 = vcombine.high %v352_v6, %v352_v6  ;;  %v1564_v58 = vpop.xlane.xlu1 %1563 }
 0x21f   : > { %3533 = vmatpush3.msk.msra.mxu0 %vm359_vm3, %v4225_v59  ;;  %3534 = vmatprep.mubr.msk.f32.mxu0 %vm3956_vm4, %v3955_v9 }
 0x220   : > { %3530 = vmatmul.mubr.msk.f32.vlgmr.msra.gmra.mrb[2].mxu1 %vm281_vm0, %v355_v0  ;;  %3542 = vmatprep.subr.mxu0 %v3955_v9  ;;  %v1566_v60 = vpop.xlane.xlu0 %1565 }
 0x221   : > { %3538 = vmatpush3.msk.msra.mxu1 %vm359_vm3, %v4234_v62  ;;  %3539 = vmatprep.mubr.msk.f32.mxu1 %vm3956_vm4, %v3955_v9 }
 0x222   : > { %3535 = vmatmul.mubr.msk.f32.vlgmr.msra.gmra.mrb[4].mxu0 %vm281_vm0, %v338_v4  ;;  %3547 = vmatprep.subr.mxu1 %v3955_v9 }
 0x223   : > { %3543 = vmatpush3.msk.msra.mxu0 %vm359_vm3, %v4243_v2  ;;  %3544 = vmatprep.mubr.msk.f32.mxu0 %vm3956_vm4, %v3955_v9 }
 0x224   : > { %3540 = vmatmul.mubr.msk.f32.vlgmr.msra.gmra.mrb[4].mxu1 %vm281_vm0, %v352_v6  ;;  %3552 = vmatprep.subr.mxu0 %v3955_v9  ;;  %v1570_v61 = vpop.xlane.xlu0 %1569 }
 0x225   : > { %3548 = vmatpush3.msk.msra.mxu1 %vm359_vm3, %v4251_v5  ;;  %3549 = vmatprep.mubr.msk.f32.mxu1 %vm3956_vm4, %v3955_v9 }
 0x226   : > { %3545 = vmatmul.mubr.msk.f32.vlgmr.msra.gmra.mrb[6].mxu0 %vm281_vm0, %v354_v7  ;;  %3557 = vmatprep.subr.mxu1 %v3955_v9 }
 0x227   : > { %3554 = vmatprep.mubr.msk.f32.mxu0 %vm3956_vm4, %v3955_v9 }
 0x228   : > { %3550 = vmatmul.mubr.msk.f32.vlgmr.msra.gmra.mrb[6].mxu1 %vm281_vm0, %v356_v8  ;;  %v1574_v0 = vpop.xlane.xlu0 %1573 }
 0x229   : > { %3559 = vmatprep.mubr.msk.f32.mxu1 %vm3956_vm4, %v3955_v9 }
 0x22a   : > { %3553 = vmatpush3.xpose.msra.mxu0 %v4174_v20 }
 0x22b   : > { %3562 = vmatprep.subr.mxu0 %v3955_v9 }
 0x22c   : > { %3558 = vmatpush3.xpose.msra.mxu1 %v4176_v21 }
 0x22d   : > { %3567 = vmatprep.subr.mxu1 %v3955_v9 }
 0x2ed   : > { %v429_v12 = vpop.f32.mrb[0].mxu0 }
 0x2ee   : > { %v1518_v13 = vmul.f32 %v429_v12, %v429_v12  ;;  %v3516_v14 = vpop.f32.mrb[1].mxu0  ;;  %3555 = vmatmul.mubr.f32.vlgmr.msra.gmra.mrb[8].mxu0 %v429_v12 }
 0x2ef   : > { %v504_v16 = vpop.f32.mrb[0].mxu1  ;;  %3563 = vmatpush3.xpose.msra.mxu0 %v4178_v22  ;;  %3564 = vmatprep.mubr.msk.f32.mxu0 %vm3956_vm4, %v3955_v9 }
 0x2f0   : > { %v1519_v18 = vmul.f32 %v504_v16, %v504_v16  ;;  %v3521_v19 = vpop.f32.mrb[1].mxu1  ;;  %3560 = vmatmul.mubr.f32.vlgmr.msra.gmra.mrb[8].mxu1 %v504_v16  ;;  %v1527_v24 = vsel %vm1526_vm6, %v1518_v13, 0.0  ;;  %3572 = vmatprep.subr.mxu0 %v3955_v9 }
 0x2f1   : > { %3568 = vmatpush3.xpose.msra.mxu1 %v4180_v23  ;;  %1528 = vadd.xlane.f32.xlu1 %v1527_v24  ;;  %v579_v25 = vpop.f32.mrb[2].mxu0 }
 0x2f2   : > { %v1520_v26 = vmul.f32 %v579_v25, %v579_v25  ;;  %v3526_v27 = vpop.f32.mrb[3].mxu0  ;;  %3565 = vmatmul.mubr.f32.vlgmr.msra.gmra.mrb[10].mxu0 %v579_v25  ;;  %v1530_v28 = vsel %vm1526_vm6, %v1519_v18, 0.0  ;;  %3569 = vmatprep.mubr.msk.f32.mxu1 %vm3956_vm4, %v3955_v9 }
 0x2f3   : > { %1531 = vadd.xlane.f32.xlu0 %v1530_v28  ;;  %v654_v31 = vpop.f32.mrb[2].mxu1  ;;  %3573 = vmatpush3.xpose.msra.mxu0 %v4191_v29 }
 0x2f4   : > { %v1521_v32 = vmul.f32 %v654_v31, %v654_v31  ;;  %3577 = vmatprep.subr.mxu1 %v3955_v9  ;;  %v3531_v33 = vpop.f32.mrb[3].mxu1  ;;  %3570 = vmatmul.mubr.f32.vlgmr.msra.gmra.mrb[10].mxu1 %v654_v31  ;;  %v1533_v35 = vsel %vm1526_vm6, %v1520_v26, 0.0 }
 0x2f5   : > { %3578 = vmatpush3.xpose.msra.mxu1 %v4193_v30  ;;  %1534 = vadd.xlane.f32.xlu1 %v1533_v35  ;;  %v729_v36 = vpop.f32.mrb[4].mxu0 }
 0x2f6   : > { %v1522_v37 = vmul.f32 %v729_v36, %v729_v36  ;;  %3574 = vmatprep.mubr.msk.f32.mxu0 %vm3956_vm4, %v3955_v9  ;;  %v3536_v38 = vpop.f32.mrb[5].mxu0  ;;  %3582 = vmatprep.subr.mxu0 %v3955_v9  ;;  %v1536_v39 = vsel %vm1526_vm6, %v1521_v32, 0.0 }
 0x2f7   : > { %3575 = vmatmul.mubr.f32.vlgmr.msra.gmra.mrb[12].mxu0 %v729_v36  ;;  %1537 = vadd.xlane.f32.xlu0 %v1536_v39  ;;  %v804_v41 = vpop.f32.mrb[4].mxu1 }
 0x2f8   : > { %v1523_v42 = vmul.f32 %v804_v41, %v804_v41  ;;  %3579 = vmatprep.mubr.msk.f32.mxu1 %vm3956_vm4, %v3955_v9  ;;  %3583 = vmatpush3.xpose.msra.mxu0 %v4203_v34  ;;  %v3541_v43 = vpop.f32.mrb[5].mxu1  ;;  %v1539_v44 = vsel %vm1526_vm6, %v1522_v37, 0.0 }
 0x2f9   : > { %3587 = vmatprep.subr.mxu1 %v3955_v9  ;;  %3580 = vmatmul.mubr.f32.vlgmr.msra.gmra.mrb[12].mxu1 %v804_v41  ;;  %v879_v45 = vpop.f32.mrb[6].mxu0 }
 0x2fa   : > { %3588 = vmatpush3.xpose.msra.mxu1 %v4277_v10  ;;  %1540 = vadd.xlane.f32.xlu1 %v1539_v44  ;;  %v1524_v46 = vmul.f32 %v879_v45, %v879_v45  ;;  %v3546_v47 = vpop.f32.mrb[7].mxu0  ;;  %v1542_v48 = vsel %vm1526_vm6, %v1523_v42, 0.0 }
 0x2fb   : > { %3584 = vmatprep.mubr.msk.f32.mxu0 %vm3956_vm4, %v3955_v9  ;;  %1543 = vadd.xlane.f32.xlu0 %v1542_v48  ;;  %v954_v49 = vpop.f32.mrb[6].mxu1 }
 0x2fc   : > { %3585 = vmatmul.mubr.f32.vlgmr.msra.gmra.mrb[14].mxu0 %v879_v45  ;;  %v1525_v50 = vmul.f32 %v954_v49, %v954_v49  ;;  %3589 = vmatprep.mubr.msk.f32.mxu1 %vm3956_vm4, %v3955_v9  ;;  %v3551_v52 = vpop.f32.mrb[7].mxu1  ;;  %v1545_v53 = vsel %vm1526_vm6, %v1524_v46, 0.0 }
 0x2fd   : > { %3590 = vmatmul.mubr.f32.vlgmr.msra.gmra.mrb[14].mxu1 %v954_v49  ;;  %3592 = vmatprep.subr.mxu0 %v3955_v9 }
 0x2fe   : > { %1546 = vadd.xlane.f32.xlu1 %v1545_v53  ;;  %v1548_v54 = vsel %vm1526_vm6, %v1525_v50, 0.0  ;;  %3593 = vmatpush3.msra.mxu0 %v4174_v20  ;;  %v1568_v20 = vpop.xlane.xlu1 %1567 }
 0x2ff   : > { %1549 = vadd.xlane.f32.xlu0 %v1548_v54  ;;  %3597 = vmatprep.subr.mxu1 %v3955_v9 }
 0x300   : > { %3598 = vmatpush3.msra.mxu1 %v4176_v21  ;;  %3594 = vmatprep.mubr.msk.f32.mxu0 %vm3956_vm4, %v3955_v9  ;;  %v4323_v21 = vsub.s32 %v4150_v3, %v4207_v40 }
 0x301   : > { %3602 = vmatprep.subr.mxu0 %v3955_v9  ;;  %3599 = vmatprep.mubr.msk.f32.mxu1 %vm3956_vm4, %v3955_v9 }
 0x302   : > { %3607 = vmatprep.subr.mxu1 %v3955_v9  ;;  %v1572_v63 = vpop.xlane.xlu1 %1571  ;;  %v1586_v6 = vrot.slane %v1560_v56, %v4323_v21  ;;  %v1590_v7 = vrot.slane %v1562_v57, %v4323_v21  ;;  %v1594_v11 = vrot.slane %v1564_v58, %v4323_v21  ;;  %v1598_v14 = vrot.slane %v1566_v60, %v4323_v21 }
 0x303   : > { %v1602_v24 = vrot.slane %v1568_v20, %v4323_v21  ;;  %v1606_v31 = vrot.slane %v1570_v61, %v4323_v21  ;;  %v1610_v35 = vrot.slane %v1572_v63, %v4323_v21  ;;  %v1614_v37 = vrot.slane %v1574_v0, %v4323_v21 }
 0x37e   : > { %v1529_v1 = vpop.xlane.xlu1 %1528 }
 0x37f   : > { %v1623_v12 = vmul.f32 %v1586_v6, %v1529_v1 }
 0x380   : > { %v1532_v4 = vpop.xlane.xlu0 %1531 }
 0x381   : > { %v1624_v16 = vmul.f32 %v1590_v7, %v1532_v4  ;;  %v1631_v18 = vmax.f32 %v1623_v12, 1e-16 }
 0x382   : > { %v1535_v8 = vpop.xlane.xlu1 %1534 }
 0x383   : > { %v1625_v19 = vmul.f32 %v1594_v11, %v1535_v8  ;;  %v1632_v26 = vmax.f32 %v1624_v16, 1e-16  ;;  %3735 = vrsqrt.f32 %v1631_v18 }
 0x384   : > { %v1538_v13 = vpop.xlane.xlu0 %1537 }
 0x385   : > { %v1626_v27 = vmul.f32 %v1598_v14, %v1538_v13  ;;  %v1633_v32 = vmax.f32 %v1625_v19, 1e-16  ;;  %3737 = vrsqrt.f32 %v1632_v26 }
 0x387   : > { %v1541_v25 = vpop.xlane.xlu1 %1540  ;;  %v1634_v36 = vmax.f32 %v1626_v27, 1e-16  ;;  %3739 = vrsqrt.f32 %v1633_v32 }
 0x388   : > { %v1544_v28 = vpop.xlane.xlu0 %1543  ;;  %v1627_v33 = vmul.f32 %v1602_v24, %v1541_v25 }
 0x389   : > { %v1628_v38 = vmul.f32 %v1606_v31, %v1544_v28  ;;  %3741 = vrsqrt.f32 %v1634_v36 }
 0x38a   : > { %v1635_v42 = vmax.f32 %v1627_v33, 1e-16 }
 0x38b   : > { %v1547_v39 = vpop.xlane.xlu1 %1546  ;;  %v1636_v44 = vmax.f32 %v1628_v38, 1e-16 }
 0x38c   : > { %v1550_v41 = vpop.xlane.xlu0 %1549  ;;  %v1629_v43 = vmul.f32 %v1610_v35, %v1547_v39  ;;  %3743 = vrsqrt.f32 %v1635_v42 }
 0x38d   : > { %v1630_v45 = vmul.f32 %v1614_v37, %v1550_v41  ;;  %v3736_v46 = vpop.eup %3735  ;;  %3745 = vrsqrt.f32 %v1636_v44 }
 0x38e   : > { %v1637_v47 = vmax.f32 %v1629_v43, 1e-16 }
 0x38f   : > { %v1638_v49 = vmax.f32 %v1630_v45, 1e-16  ;;  %v3738_v53 = vpop.eup %3737 }
 0x390   : > { %3747 = vrsqrt.f32 %v1637_v47 }
 0x391   : > { %v3740_v60 = vpop.eup %3739  ;;  %3749 = vrsqrt.f32 %v1638_v49 }
 0x393   : > { %v3742_v1 = vpop.eup %3741 }
 0x396   : > { %v3744_v11 = vpop.eup %3743 }
 0x397   : > { %v3746_v18 = vpop.eup %3745 }
 0x39a   : > { %v3748_v27 = vpop.eup %3747 }
 0x39b   : > { %v3750_v32 = vpop.eup %3749 }
 0x3c1   : > { %v1024_v48 = vpop.f32.mrb[8].mxu0 }
 0x3c2   : > { %v1647_v50 = vmul.f32 %v3736_v46, %v1024_v48  ;;  %v3556_v52 = vpop.f32.mrb[9].mxu0 }
 0x3c3   : > { %v1094_v54 = vpop.f32.mrb[8].mxu1 }
 0x3c4   : > { %v1648_v56 = vmul.f32 %v3738_v53, %v1094_v54  ;;  %v3561_v57 = vpop.f32.mrb[9].mxu1  ;;  %v1656_v58 = vsel %vm1655_vm7, %v1647_v50, -inf }
 0x3c5   : > { %1657 = vmax.xlane.f32.xlu1 %v1656_v58  ;;  %v1164_v20 = vpop.f32.mrb[10].mxu0 }
 0x3c6   : > { %v1649_v61 = vmul.f32 %v3740_v60, %v1164_v20  ;;  %v3566_v63 = vpop.f32.mrb[11].mxu0  ;;  %v1659_v0 = vsel %vm1655_vm7, %v1648_v56, -inf }
 0x3c7   : > { %1660 = vmax.xlane.f32.xlu0 %v1659_v0  ;;  %v1234_v4 = vpop.f32.mrb[10].mxu1 }
 0x3c8   : > { %v1650_v6 = vmul.f32 %v3742_v1, %v1234_v4  ;;  %v3571_v7 = vpop.f32.mrb[11].mxu1  ;;  %v1662_v8 = vsel %vm1655_vm7, %v1649_v61, -inf }
 0x3c9   : > { %1663 = vmax.xlane.f32.xlu1 %v1662_v8 }
 0x3ca   : > { %v1304_v12 = vpop.f32.mrb[12].mxu0  ;;  %v1665_v13 = vsel %vm1655_vm7, %v1650_v6, -inf }
 0x3cb   : > { %v1651_v14 = vmul.f32 %v3744_v11, %v1304_v12  ;;  %v3576_v16 = vpop.f32.mrb[13].mxu0  ;;  %1666 = vmax.xlane.f32.xlu0 %v1665_v13 }
 0x3cc   : > { %v1374_v19 = vpop.f32.mrb[12].mxu1 }
 0x3cd   : > { %v1652_v24 = vmul.f32 %v3746_v18, %v1374_v19  ;;  %v3581_v25 = vpop.f32.mrb[13].mxu1  ;;  %v1668_v26 = vsel %vm1655_vm7, %v1651_v14, -inf }
 0x3ce   : > { %1669 = vmax.xlane.f32.xlu1 %v1668_v26 }
 0x3cf   : > { %v1444_v28 = vpop.f32.mrb[14].mxu0  ;;  %v1671_v31 = vsel %vm1655_vm7, %v1652_v24, -inf }
 0x3d0   : > { %v1653_v33 = vmul.f32 %v3748_v27, %v1444_v28  ;;  %v3586_v35 = vpop.f32.mrb[15].mxu0  ;;  %1672 = vmax.xlane.f32.xlu0 %v1671_v31  ;;  %v1514_v36 = vpop.f32.mrb[14].mxu1 }
 0x3d1   : > { %v1654_v37 = vmul.f32 %v3750_v32, %v1514_v36  ;;  %v3591_v38 = vpop.f32.mrb[15].mxu1  ;;  %v2923_v35 = vmul.f32 %v4214_v51, %v4214_v51  ;;  %v2921_v36 = vmul.f32 %v4157_v15, %v4157_v15 }
 0x3d2   : > { %v1674_v39 = vsel %vm1655_vm7, %v1653_v33, -inf  ;;  %v2924_v38 = vmul.f32 %v4217_v55, %v4217_v55 }
 0x3d3   : > { %1675 = vmax.xlane.f32.xlu1 %v1674_v39  ;;  %v1677_v41 = vsel %vm1655_vm7, %v1654_v37, -inf  ;;  %v2935_v39 = vsel %vm359_vm3, %v2923_v35, 0.0 }
 0x3d4   : > { %1678 = vmax.xlane.f32.xlu0 %v1677_v41 }
 0x452   : > { %v1658_v42 = vpop.xlane.xlu1 %1657 }
 0x453   : > { %v1680_v43 = vsub.f32 %v1647_v50, %v1658_v42  ;;  %v2929_v42 = vsel %vm359_vm3, %v2921_v36, 0.0 }
 0x454   : > { %v1661_v44 = vpop.xlane.xlu0 %1660 }
 0x455   : > { %v1688_v45 = vmul.f32 1.442695, %v1680_v43  ;;  %v1681_v46 = vsub.f32 %v1648_v56, %v1661_v44  ;;  %v2926_v43 = vmul.f32 %v4234_v62, %v4234_v62  ;;  %v2938_v44 = vsel %vm359_vm3, %v2924_v38, 0.0 }
 0x456   : > { %v1664_v47 = vpop.xlane.xlu1 %1663 }
 0x457   : > { %3751 = vpow2.f32 %v1688_v45  ;;  %v1690_v48 = vmul.f32 1.442695, %v1681_v46  ;;  %v1682_v49 = vsub.f32 %v1649_v61, %v1664_v47  ;;  %v2944_v45 = vsel %vm359_vm3, %v2926_v43, 0.0 }
 0x458   : > { %v1667_v52 = vpop.xlane.xlu0 %1666  ;;  %v2927_v46 = vmul.f32 %v4243_v2, %v4243_v2 }
 0x459   : > { %3753 = vpow2.f32 %v1690_v48  ;;  %v1692_v53 = vmul.f32 1.442695, %v1682_v49  ;;  %v1683_v54 = vsub.f32 %v1650_v6, %v1667_v52 }
 0x45a   : > { %v2947_v47 = vsel %vm359_vm3, %v2927_v46, 0.0 }
 0x45b   : > { %3755 = vpow2.f32 %v1692_v53  ;;  %v1694_v57 = vmul.f32 1.442695, %v1683_v54  ;;  %v1670_v58 = vpop.xlane.xlu1 %1669 }
 0x45c   : > { %v1684_v60 = vsub.f32 %v1651_v14, %v1670_v58 }
 0x45d   : > { %3757 = vpow2.f32 %v1694_v57  ;;  %v1673_v20 = vpop.xlane.xlu0 %1672 }
 0x45e   : > { %v1696_v63 = vmul.f32 1.442695, %v1684_v60  ;;  %v1685_v0 = vsub.f32 %v1652_v24, %v1673_v20 }
 0x460   : > { %3759 = vpow2.f32 %v1696_v63  ;;  %v1698_v50 = vmul.f32 1.442695, %v1685_v0  ;;  %v1676_v1 = vpop.xlane.xlu1 %1675 }
 0x461   : > { %v4341_v56 = vpop.eup %3751  ;;  %v1686_v4 = vsub.f32 %v1653_v33, %v1676_v1  ;;  %v1679_v7 = vpop.xlane.xlu0 %1678 }
 0x462   : > { %3761 = vpow2.f32 %v1698_v50  ;;  %v1687_v61 = vsub.f32 %v1654_v37, %v1679_v7  ;;  %v1704_v6 = vsel %vm1655_vm7, %v4341_v56, 0.0  ;;  %v2922_v37 = vmul.f32 %v4164_v17, %v4164_v17 }
 0x463   : > { %v3754_v8 = vpop.eup %3753  ;;  %v1700_v11 = vmul.f32 1.442695, %v1686_v4  ;;  %1705 = vadd.xlane.f32.xlu1 %v1704_v6 }
 0x464   : > { %v1702_v12 = vmul.f32 1.442695, %v1687_v61  ;;  %v1707_v13 = vsel %vm1655_vm7, %v3754_v8, 0.0  ;;  %v2932_v41 = vsel %vm359_vm3, %v2922_v37, 0.0 }
 0x465   : > { %v4346_v14 = vpop.eup %3755  ;;  %3763 = vpow2.f32 %v1700_v11  ;;  %1708 = vadd.xlane.f32.xlu0 %v1707_v13 }
 0x466   : > { %3765 = vpow2.f32 %v1702_v12  ;;  %v1710_v16 = vsel %vm1655_vm7, %v4346_v14, 0.0 }
 0x467   : > { %v4350_v18 = vpop.eup %3757  ;;  %1711 = vadd.xlane.f32.xlu1 %v1710_v16 }
 0x468   : > { %v1713_v19 = vsel %vm1655_vm7, %v4350_v18, 0.0 }
 0x469   : > { %1714 = vadd.xlane.f32.xlu0 %v1713_v19 }
 0x46a   : > { %v4354_v24 = vpop.eup %3759 }
 0x46b   : > { %v1716_v25 = vsel %vm1655_vm7, %v4354_v24, 0.0 }
 0x46c   : > { %v4358_v26 = vpop.eup %3761  ;;  %1717 = vadd.xlane.f32.xlu1 %v1716_v25 }
 0x46d   : > { %v1719_v27 = vsel %vm1655_vm7, %v4358_v26, 0.0 }
 0x46e   : > { %1720 = vadd.xlane.f32.xlu0 %v1719_v27 }
 0x46f   : > { %v4362_v28 = vpop.eup %3763 }
 0x470   : > { %v4364_v31 = vpop.eup %3765  ;;  %v1722_v32 = vsel %vm1655_vm7, %v4362_v28, 0.0 }
 0x471   : > { %1723 = vadd.xlane.f32.xlu1 %v1722_v32  ;;  %v1725_v33 = vsel %vm1655_vm7, %v4364_v31, 0.0 }
 0x472   : > { %1726 = vadd.xlane.f32.xlu0 %v1725_v33 }
 0x475   : > { %2933 = vadd.xlane.f32.xlu1 %v2932_v41 }
 0x476   : > { %2936 = vadd.xlane.f32.xlu0 %v2935_v39 }
 0x479   : > { %2939 = vadd.xlane.f32.xlu1 %v2938_v44 }
 0x47a   : > { %2930 = vadd.xlane.f32.xlu0 %v2929_v42 }
 0x47e   : > { %2945 = vadd.xlane.f32.xlu0 %v2944_v45 }
 0x482   : > { %2948 = vadd.xlane.f32.xlu0 %v2947_v47 }
 0x4f0   : > { %v1706_v48 = vpop.xlane.xlu1 %1705 }
 0x4f1   : > { %3767 = vrcp.f32 %v1706_v48 }
 0x4f2   : > { %v1709_v49 = vpop.xlane.xlu0 %1708 }
 0x4f3   : > { %3769 = vrcp.f32 %v1709_v49 }
 0x4f4   : > { %v1712_v52 = vpop.xlane.xlu1 %1711 }
 0x4f5   : > { %3771 = vrcp.f32 %v1712_v52 }
 0x4f6   : > { %v1715_v53 = vpop.xlane.xlu0 %1714 }
 0x4f7   : > { %3773 = vrcp.f32 %v1715_v53 }
 0x4f9   : > { %v1718_v54 = vpop.xlane.xlu1 %1717 }
 0x4fa   : > { %3775 = vrcp.f32 %v1718_v54 }
 0x4fb   : > { %v3768_v57 = vpop.eup %3767  ;;  %v1721_v58 = vpop.xlane.xlu0 %1720 }
 0x4fc   : > { %v1736_v60 = vmul.f32 %v3768_v57, %v4341_v56  ;;  %3777 = vrcp.f32 %v1721_v58 }
 0x4fd   : > { %v3770_v20 = vpop.eup %3769 }
 0x4fe   : > { %v1737_v63 = vmul.f32 %v3770_v20, %v3754_v8  ;;  %v1724_v0 = vpop.xlane.xlu1 %1723  ;;  %3595 = vmatmul.mubr.msk.f32.vlgmr.msra.gmra.mrb[16].mxu0 %vm1744_vm8, %v1736_v60 }
 0x4ff   : > { %v3772_v50 = vpop.eup %3771  ;;  %3779 = vrcp.f32 %v1724_v0  ;;  %v1727_v1 = vpop.xlane.xlu0 %1726  ;;  %3603 = vmatpush3.msra.mxu0 %v4178_v22  ;;  %3604 = vmatprep.mubr.msk.f32.mxu0 %vm3956_vm4, %v3955_v9 }
 0x500   : > { %v1738_v4 = vmul.f32 %v3772_v50, %v4346_v14  ;;  %3781 = vrcp.f32 %v1727_v1  ;;  %3600 = vmatmul.mubr.msk.f32.vlgmr.msra.gmra.mrb[16].mxu1 %vm1744_vm8, %v1737_v63  ;;  %3612 = vmatprep.subr.mxu0 %v3955_v9 }
 0x501   : > { %v3774_v56 = vpop.eup %3773  ;;  %3608 = vmatpush3.msra.mxu1 %v4180_v23  ;;  %3609 = vmatprep.mubr.msk.f32.mxu1 %vm3956_vm4, %v3955_v9 }
 0x502   : > { %v1739_v7 = vmul.f32 %v3774_v56, %v4350_v18  ;;  %3605 = vmatmul.mubr.msk.f32.vlgmr.msra.gmra.mrb[18].mxu0 %vm1744_vm8, %v1738_v4  ;;  %3617 = vmatprep.subr.mxu1 %v3955_v9  ;;  %v2934_v48 = vpop.xlane.xlu1 %2933 }
 0x503   : > { %3613 = vmatpush3.msra.mxu0 %v4191_v29  ;;  %3614 = vmatprep.mubr.msk.f32.mxu0 %vm3956_vm4, %v3955_v9  ;;  %v2937_v49 = vpop.xlane.xlu0 %2936  ;;  %v2968_v0 = vrot.slane %v2934_v48, %v4323_v21 }
 0x504   : > { %v3776_v22 = vpop.eup %3775  ;;  %3610 = vmatmul.mubr.msk.f32.vlgmr.msra.gmra.mrb[18].mxu1 %vm1744_vm8, %v1739_v7  ;;  %3622 = vmatprep.subr.mxu0 %v3955_v9  ;;  %v2972_v4 = vrot.slane %v2937_v49, %v4323_v21 }
 0x505   : > { %v1740_v23 = vmul.f32 %v3776_v22, %v4354_v24  ;;  %3618 = vmatpush3.msra.mxu1 %v4193_v30  ;;  %3619 = vmatprep.mubr.msk.f32.mxu1 %vm3956_vm4, %v3955_v9 }
 0x506   : > { %v3778_v61 = vpop.eup %3777  ;;  %3627 = vmatprep.subr.mxu1 %v3955_v9  ;;  %v2940_v52 = vpop.xlane.xlu1 %2939 }
 0x507   : > { %v1741_v29 = vmul.f32 %v3778_v61, %v4358_v26  ;;  %3615 = vmatmul.mubr.msk.f32.vlgmr.msra.gmra.mrb[20].mxu0 %vm1744_vm8, %v1740_v23  ;;  %v2931_v53 = vpop.xlane.xlu0 %2930  ;;  %v2976_v7 = vrot.slane %v2940_v52, %v4323_v21 }
 0x508   : > { %3623 = vmatpush3.msra.mxu0 %v4203_v34  ;;  %3624 = vmatprep.mubr.msk.f32.mxu0 %vm3956_vm4, %v3955_v9  ;;  %v2925_v34 = vmul.f32 %v4225_v59, %v4225_v59  ;;  %v2964_v50 = vrot.slane %v2931_v53, %v4323_v21 }
 0x509   : > { %v3780_v6 = vpop.eup %3779  ;;  %3620 = vmatmul.mubr.msk.f32.vlgmr.msra.gmra.mrb[20].mxu1 %vm1744_vm8, %v1741_v29  ;;  %3632 = vmatprep.subr.mxu0 %v3955_v9 }
 0x50a   : > { %v3782_v30 = vpop.eup %3781  ;;  %v1742_v8 = vmul.f32 %v3780_v6, %v4362_v28  ;;  %3628 = vmatpush3.msra.mxu1 %v4277_v10  ;;  %3629 = vmatprep.mubr.msk.f32.mxu1 %vm3956_vm4, %v3955_v9  ;;  %v2941_v10 = vsel %vm359_vm3, %v2925_v34, 0.0 }
 0x50b   : > { %v1743_v11 = vmul.f32 %v3782_v30, %v4364_v31  ;;  %3637 = vmatprep.subr.mxu1 %v3955_v9  ;;  %2942 = vadd.xlane.f32.xlu1 %v2941_v10  ;;  %v2928_v31 = vmul.f32 %v4251_v5, %v4251_v5  ;;  %v2946_v57 = vpop.xlane.xlu0 %2945 }
 0x50c   : > { %3625 = vmatmul.mubr.msk.f32.vlgmr.msra.gmra.mrb[22].mxu0 %vm1744_vm8, %v1742_v8  ;;  %v2984_v34 = vrot.slane %v2946_v57, %v4323_v21 }
 0x50d   : > { %3630 = vmatmul.mubr.msk.f32.vlgmr.msra.gmra.mrb[22].mxu1 %vm1744_vm8, %v1743_v11  ;;  %3634 = vmatprep.mubr.msk.f32.mxu0 %vm3956_vm4, %v3955_v9 }
 0x50e   : > { %3639 = vmatprep.mubr.msk.f32.mxu1 %vm3956_vm4, %v3955_v9 }
 0x50f   : > { %3633 = vmatpush3.xpose.msra.mxu0 %v4157_v15  ;;  %v2949_v60 = vpop.xlane.xlu0 %2948 }
 0x510   : > { %3642 = vmatprep.subr.mxu0 %v3955_v9 }
 0x511   : > { %3638 = vmatpush3.xpose.msra.mxu1 %v4164_v17 }
 0x512   : > { %3647 = vmatprep.subr.mxu1 %v3955_v9 }
 0x598   : > { %v2943_v54 = vpop.xlane.xlu1 %2942 }
 0x599   : > { %v2980_v29 = vrot.slane %v2943_v54, %v4323_v21 }
 0x5d1   : > { %v1814_v12 = vpop.f32.mrb[16].mxu0 }
 0x5d2   : > { %v2889_v13 = vmul.f32 %v1814_v12, %v1814_v12  ;;  %v3596_v14 = vpop.f32.mrb[17].mxu0  ;;  %3635 = vmatmul.mubr.f32.vlgmr.msra.gmra.mrb[24].mxu0 %v1814_v12 }
 0x5d3   : > { %v1887_v16 = vpop.f32.mrb[16].mxu1  ;;  %3643 = vmatpush3.xpose.msra.mxu0 %v4214_v51  ;;  %3644 = vmatprep.mubr.msk.f32.mxu0 %vm3956_vm4, %v3955_v9  ;;  %v2988_v14 = vrot.slane %v2949_v60, %v4323_v21 }
 0x5d4   : > { %v2890_v15 = vmul.f32 %v1887_v16, %v1887_v16  ;;  %v3601_v17 = vpop.f32.mrb[17].mxu1  ;;  %3640 = vmatmul.mubr.f32.vlgmr.msra.gmra.mrb[24].mxu1 %v1887_v16  ;;  %v2897_v18 = vsel %vm1526_vm6, %v2889_v13, 0.0  ;;  %3652 = vmatprep.subr.mxu0 %v3955_v9 }
 0x5d5   : > { %3648 = vmatpush3.xpose.msra.mxu1 %v4217_v55  ;;  %2898 = vadd.xlane.f32.xlu0 %v2897_v18  ;;  %v1960_v19 = vpop.f32.mrb[18].mxu0 }
 0x5d6   : > { %v2891_v24 = vmul.f32 %v1960_v19, %v1960_v19  ;;  %v3606_v25 = vpop.f32.mrb[19].mxu0  ;;  %3645 = vmatmul.mubr.f32.vlgmr.msra.gmra.mrb[26].mxu0 %v1960_v19  ;;  %3649 = vmatprep.mubr.msk.f32.mxu1 %vm3956_vm4, %v3955_v9  ;;  %v2900_v51 = vsel %vm1526_vm6, %v2890_v15, 0.0 }
 0x5d7   : > { %v2033_v26 = vpop.f32.mrb[18].mxu1  ;;  %3657 = vmatprep.subr.mxu1 %v3955_v9  ;;  %2901 = vadd.xlane.f32.xlu1 %v2900_v51 }
 0x5d8   : > { %v2892_v27 = vmul.f32 %v2033_v26, %v2033_v26  ;;  %3653 = vmatpush3.xpose.msra.mxu0 %v4225_v59  ;;  %v3611_v28 = vpop.f32.mrb[19].mxu1  ;;  %3650 = vmatmul.mubr.f32.vlgmr.msra.gmra.mrb[26].mxu1 %v2033_v26  ;;  %v2903_v55 = vsel %vm1526_vm6, %v2891_v24, 0.0 }
 0x5d9   : > { %3658 = vmatpush3.xpose.msra.mxu1 %v4234_v62  ;;  %2904 = vadd.xlane.f32.xlu0 %v2903_v55  ;;  %v2950_v62 = vsel %vm359_vm3, %v2928_v31, 0.0 }
 0x5da   : > { %v2106_v32 = vpop.f32.mrb[20].mxu0  ;;  %3654 = vmatprep.mubr.msk.f32.mxu0 %vm3956_vm4, %v3955_v9  ;;  %3662 = vmatprep.subr.mxu0 %v3955_v9  ;;  %v2906_v33 = vsel %vm1526_vm6, %v2892_v27, 0.0 }
 0x5db   : > { %v2893_v35 = vmul.f32 %v2106_v32, %v2106_v32  ;;  %v3616_v59 = vpop.f32.mrb[21].mxu0  ;;  %3655 = vmatmul.mubr.f32.vlgmr.msra.gmra.mrb[28].mxu0 %v2106_v32  ;;  %3659 = vmatprep.mubr.msk.f32.mxu1 %vm3956_vm4, %v3955_v9 }
 0x5dc   : > { %v2179_v36 = vpop.f32.mrb[20].mxu1  ;;  %3667 = vmatprep.subr.mxu1 %v3955_v9  ;;  %2907 = vadd.xlane.f32.xlu1 %v2906_v33 }
 0x5dd   : > { %3663 = vmatpush3.xpose.msra.mxu0 %v4243_v2  ;;  %v3621_v37 = vpop.f32.mrb[21].mxu1  ;;  %3660 = vmatmul.mubr.f32.vlgmr.msra.gmra.mrb[28].mxu1 %v2179_v36  ;;  %v2894_v38 = vmul.f32 %v2179_v36, %v2179_v36  ;;  %v2909_v41 = vsel %vm1526_vm6, %v2893_v35, 0.0 }
 0x5de   : > { %3668 = vmatpush3.xpose.msra.mxu1 %v4251_v5  ;;  %3664 = vmatprep.mubr.msk.f32.mxu0 %vm3956_vm4, %v3955_v9 }
 0x5df   : > { %v2252_v39 = vpop.f32.mrb[22].mxu0  ;;  %3669 = vmatprep.mubr.msk.f32.mxu1 %vm3956_vm4, %v3955_v9  ;;  %2951 = vadd.xlane.f32.xlu0 %v2950_v62  ;;  %v2912_v46 = vsel %vm1526_vm6, %v2894_v38, 0.0 }
 0x5e0   : > { %v3626_v42 = vpop.f32.mrb[23].mxu0  ;;  %3665 = vmatmul.mubr.f32.vlgmr.msra.gmra.mrb[30].mxu0 %v2252_v39  ;;  %v2325_v43 = vpop.f32.mrb[22].mxu1  ;;  %2910 = vadd.xlane.f32.xlu1 %v2909_v41  ;;  %v2895_v5 = vmul.f32 %v2252_v39, %v2252_v39 }
 0x5e1   : > { %v2896_v2 = vmul.f32 %v2325_v43, %v2325_v43  ;;  %v3631_v44 = vpop.f32.mrb[23].mxu1  ;;  %3670 = vmatmul.mubr.f32.vlgmr.msra.gmra.mrb[30].mxu1 %v2325_v43  ;;  %3672 = vmatprep.subr.mxu0 %v3955_v9 }
 0x5e2   : > { %3674 = vmatprep.mubr.msk.f32.mxu0 %vm3956_vm4, %v3955_v9  ;;  %v2915_v47 = vsel %vm1526_vm6, %v2895_v5, 0.0 }
 0x5e3   : > { %v2918_v45 = vsel %vm1526_vm6, %v2896_v2, 0.0 }
 0x5e4   : > { %2919 = vadd.xlane.f32.xlu0 %v2918_v45  ;;  %2913 = vadd.xlane.f32.xlu1 %v2912_v46 }
 0x5e8   : > { %2916 = vadd.xlane.f32.xlu1 %v2915_v47 }
 0x662   : > { %v2899_v63 = vpop.xlane.xlu0 %2898 }
 0x663   : > { %v3001_v23 = vmul.f32 %v2964_v50, %v2899_v63 }
 0x664   : > { %v2902_v58 = vpop.xlane.xlu1 %2901 }
 0x665   : > { %v3002_v22 = vmul.f32 %v2968_v0, %v2902_v58  ;;  %v3009_v10 = vmax.f32 %v3001_v23, 1e-16 }
 0x666   : > { %v2905_v56 = vpop.xlane.xlu0 %2904 }
 0x667   : > { %v3003_v61 = vmul.f32 %v2972_v4, %v2905_v56  ;;  %v3010_v30 = vmax.f32 %v3002_v22, 1e-16 }
 0x669   : > { %v2908_v20 = vpop.xlane.xlu1 %2907  ;;  %v3011_v12 = vmax.f32 %v3003_v61, 1e-16  ;;  %3783 = vrsqrt.f32 %v3010_v30 }
 0x66a   : > { %v3004_v8 = vmul.f32 %v2976_v7, %v2908_v20  ;;  %3785 = vrsqrt.f32 %v3009_v10 }
 0x66b   : > { %3787 = vrsqrt.f32 %v3011_v12 }
 0x66c   : > { %v2952_v11 = vpop.xlane.xlu0 %2951  ;;  %v3012_v16 = vmax.f32 %v3004_v8, 1e-16 }
 0x66d   : > { %v2911_v1 = vpop.xlane.xlu1 %2910  ;;  %v2992_v15 = vrot.slane %v2952_v11, %v4323_v21 }
 0x66e   : > { %v3005_v13 = vmul.f32 %v2980_v29, %v2911_v1  ;;  %3789 = vrsqrt.f32 %v3012_v16 }
 0x670   : > { %v3013_v24 = vmax.f32 %v3005_v13, 1e-16 }
 0x671   : > { %v2914_v6 = vpop.xlane.xlu1 %2913  ;;  %v2920_v19 = vpop.xlane.xlu0 %2919 }
 0x672   : > { %v3006_v17 = vmul.f32 %v2984_v34, %v2914_v6  ;;  %v3008_v51 = vmul.f32 %v2992_v15, %v2920_v19  ;;  %3791 = vrsqrt.f32 %v3013_v24 }
 0x673   : > { %v3784_v32 = vpop.eup %3783 }
 0x674   : > { %v3014_v26 = vmax.f32 %v3006_v17, 1e-16  ;;  %v3016_v55 = vmax.f32 %v3008_v51, 1e-16  ;;  %v3786_v35 = vpop.eup %3785 }
 0x675   : > { %v2917_v18 = vpop.xlane.xlu1 %2916  ;;  %v3788_v36 = vpop.eup %3787 }
 0x676   : > { %v3007_v25 = vmul.f32 %v2988_v14, %v2917_v18  ;;  %3793 = vrsqrt.f32 %v3014_v26 }
 0x678   : > { %v3015_v27 = vmax.f32 %v3007_v25, 1e-16  ;;  %v3790_v42 = vpop.eup %3789 }
 0x67a   : > { %3795 = vrsqrt.f32 %v3015_v27 }
 0x67b   : > { %3797 = vrsqrt.f32 %v3016_v55 }
 0x67c   : > { %v3792_v46 = vpop.eup %3791 }
 0x680   : > { %v3794_v54 = vpop.eup %3793 }
 0x684   : > { %v3796_v0 = vpop.eup %3795 }
 0x685   : > { %v3798_v56 = vpop.eup %3797 }
 0x6a5   : > { %v2395_v28 = vpop.f32.mrb[24].mxu0 }
 0x6a6   : > { %v3636_v31 = vpop.f32.mrb[25].mxu0  ;;  %v3025_v37 = vmul.f32 %v3786_v35, %v2395_v28 }
 0x6a7   : > { %v2465_v33 = vpop.f32.mrb[24].mxu1 }
 0x6a8   : > { %v3026_v59 = vmul.f32 %v3784_v32, %v2465_v33  ;;  %v3641_v21 = vpop.f32.mrb[25].mxu1 }
 0x6a9   : > { %v2535_v62 = vpop.f32.mrb[26].mxu0 }
 0x6aa   : > { %v3041_v38 = vrot.slane %v3026_v59, 7  ;;  %v3027_v39 = vmul.f32 %v3788_v36, %v2535_v62  ;;  %v3646_v41 = vpop.f32.mrb[27].mxu0 }
 0x6ab   : > { %v2605_v43 = vpop.f32.mrb[26].mxu1 }
 0x6ac   : > { %v3043_v2 = vsel %vm3042_vm9, %v3041_v38, %v3025_v37  ;;  %v3044_v44 = vrot.slane %v3027_v39, 6  ;;  %v3028_v5 = vmul.f32 %v3790_v42, %v2605_v43  ;;  %v3651_v45 = vpop.f32.mrb[27].mxu1 }
 0x6ae   : > { %v3046_v47 = vsel %vm3045_vm10, %v3044_v44, %v3043_v2  ;;  %v3047_v48 = vrot.slane %v3028_v5, 5  ;;  %v2675_v49 = vpop.f32.mrb[28].mxu0 }
 0x6af   : > { %v3029_v52 = vmul.f32 %v3792_v46, %v2675_v49  ;;  %v3656_v53 = vpop.f32.mrb[29].mxu0 }
 0x6b0   : > { %v3049_v57 = vsel %vm3048_vm11, %v3047_v48, %v3046_v47  ;;  %v2745_v58 = vpop.f32.mrb[28].mxu1 }
 0x6b1   : > { %v3050_v60 = vrot.slane %v3029_v52, 4  ;;  %v3030_v20 = vmul.f32 %v3794_v54, %v2745_v58  ;;  %v3661_v63 = vpop.f32.mrb[29].mxu1 }
 0x6b3   : > { %v3052_v50 = vsel %vm3051_vm12, %v3050_v60, %v3049_v57  ;;  %v3053_v1 = vrot.slane %v3030_v20, 3  ;;  %v2815_v4 = vpop.f32.mrb[30].mxu0 }
 0x6b4   : > { %v3031_v7 = vmul.f32 %v3796_v0, %v2815_v4  ;;  %v3666_v22 = vpop.f32.mrb[31].mxu0  ;;  %v2885_v23 = vpop.f32.mrb[30].mxu1 }
 0x6b5   : > { %v3032_v61 = vmul.f32 %v3798_v56, %v2885_v23  ;;  %v3671_v29 = vpop.f32.mrb[31].mxu1  ;;  %v3055_v6 = vsel %vm3054_vm13, %v3053_v1, %v3052_v50  ;;  %v3418_v1 = vsel %vm3159_vm1, 1.0, %v3955_v9 }
 0x6b6   : > { %v3056_v30 = vrot.slane %v3031_v7, 2  ;;  %3673 = vmatpush3.msk.msra.mxu0 %vm359_vm3, %v3418_v1 }
 0x6b7   : > { %v3059_v8 = vrot.slane %v3032_v61, 1 }
 0x6b8   : > { %v3058_v11 = vsel %vm3057_vm14, %v3056_v30, %v3055_v6 }
 0x6b9   : > { %v3061_v34 = vsel %vm3060_vm15, %v3059_v8, %v3058_v11 }
 0x6ba   : > { %v3063_v10 = vsel %vm281_vm0, %v3061_v34, -inf }
 0x6bb   : > { %3064 = vmax.xlane.f32.xlu1 %v3063_v10 }
 0x748   : > { %v3065_v12 = vpop.xlane.xlu1 %3064 }
 0x749   : > { %v3067_v13 = vrot.slane %v3065_v12, 1  ;;  %v3068_v14 = vrot.slane %v3065_v12, 2  ;;  %v3069_v16 = vrot.slane %v3065_v12, 3  ;;  %v3070_v15 = vrot.slane %v3065_v12, 4 }
 0x74a   : > { %v3071_v17 = vrot.slane %v3065_v12, 5  ;;  %v3072_v18 = vrot.slane %v3065_v12, 6  ;;  %v3073_v19 = vrot.slane %v3065_v12, 7  ;;  %v3082_v24 = vsub.f32 %v3025_v37, %v3065_v12 }
 0x74b   : > { %v3083_v25 = vsub.f32 %v3026_v59, %v3067_v13  ;;  %v3084_v51 = vsub.f32 %v3027_v39, %v3068_v14  ;;  %v3085_v26 = vsub.f32 %v3028_v5, %v3069_v16  ;;  %v3086_v27 = vsub.f32 %v3029_v52, %v3070_v15 }
 0x74c   : > { %v3087_v28 = vsub.f32 %v3030_v20, %v3071_v17  ;;  %v3088_v55 = vsub.f32 %v3031_v7, %v3072_v18  ;;  %v3090_v31 = vmul.f32 1.442695, %v3082_v24  ;;  %v3089_v32 = vsub.f32 %v3032_v61, %v3073_v19 }
 0x74d   : > { %v3092_v33 = vmul.f32 1.442695, %v3083_v25  ;;  %v3094_v35 = vmul.f32 1.442695, %v3084_v51  ;;  %v3096_v21 = vmul.f32 1.442695, %v3085_v26 }
 0x74e   : > { %3799 = vpow2.f32 %v3090_v31  ;;  %v3098_v36 = vmul.f32 1.442695, %v3086_v27  ;;  %v3100_v62 = vmul.f32 1.442695, %v3087_v28  ;;  %v3102_v38 = vmul.f32 1.442695, %v3088_v55 }
 0x74f   : > { %3801 = vpow2.f32 %v3092_v33  ;;  %v3104_v41 = vmul.f32 1.442695, %v3089_v32 }
 0x750   : > { %3803 = vpow2.f32 %v3094_v35 }
 0x751   : > { %3805 = vpow2.f32 %v3096_v21 }
 0x752   : > { %3807 = vpow2.f32 %v3098_v36 }
 0x753   : > { %3809 = vpow2.f32 %v3100_v62 }
 0x754   : > { %3811 = vpow2.f32 %v3102_v38 }
 0x755   : > { %3813 = vpow2.f32 %v3104_v41 }
 0x758   : > { %v3800_v59 = vpop.eup %3799 }
 0x759   : > { %v3802_v37 = vpop.eup %3801 }
 0x75a   : > { %v3804_v39 = vpop.eup %3803  ;;  %v3114_v42 = vrot.slane %v3802_v37, 7 }
 0x75b   : > { %v3806_v43 = vpop.eup %3805  ;;  %v3116_v2 = vrot.slane %v3804_v39, 6 }
 0x75c   : > { %v3808_v44 = vpop.eup %3807  ;;  %v3115_v5 = vsel %vm3042_vm9, %v3114_v42, %v3800_v59  ;;  %v3118_v45 = vrot.slane %v3806_v43, 5 }
 0x75d   : > { %v3810_v46 = vpop.eup %3809  ;;  %v3117_v47 = vsel %vm3045_vm10, %v3116_v2, %v3115_v5  ;;  %v3120_v48 = vrot.slane %v3808_v44, 4 }
 0x75e   : > { %v3812_v49 = vpop.eup %3811  ;;  %v3119_v52 = vsel %vm3048_vm11, %v3118_v45, %v3117_v47  ;;  %v3122_v53 = vrot.slane %v3810_v46, 3 }
 0x75f   : > { %v3814_v54 = vpop.eup %3813  ;;  %v3121_v57 = vsel %vm3051_vm12, %v3120_v48, %v3119_v52  ;;  %v3124_v58 = vrot.slane %v3812_v49, 2 }
 0x760   : > { %v3123_v60 = vsel %vm3054_vm13, %v3122_v53, %v3121_v57  ;;  %v3126_v20 = vrot.slane %v3814_v54, 1 }
 0x761   : > { %v3125_v63 = vsel %vm3057_vm14, %v3124_v58, %v3123_v60 }
 0x762   : > { %v3127_v0 = vsel %vm3060_vm15, %v3126_v20, %v3125_v63 }
 0x763   : > { %v3129_v50 = vsel %vm281_vm0, %v3127_v0, 0.0 }
 0x764   : > { %3130 = vadd.xlane.f32.xlu0 %v3129_v50 }
 0x7f1   : > { %v3131_v4 = vpop.xlane.xlu0 %3130 }
 0x7f2   : > { %3815 = vrcp.f32 %v3131_v4 }
 0x7fc   : > { %v3816_v56 = vpop.eup %3815 }
 0x7fd   : > { %v3134_v7 = vrot.slane %v3816_v56, 1  ;;  %v3135_v22 = vrot.slane %v3816_v56, 2  ;;  %v3136_v23 = vrot.slane %v3816_v56, 3  ;;  %v3137_v61 = vrot.slane %v3816_v56, 4 }
 0x7fe   : > { %v3138_v29 = vrot.slane %v3816_v56, 5  ;;  %v3139_v6 = vrot.slane %v3816_v56, 6  ;;  %v3140_v30 = vrot.slane %v3816_v56, 7  ;;  %v3149_v12 = vmul.f32 %v3816_v56, %v3800_v59 }
 0x7ff   : > { %v3150_v8 = vmul.f32 %v3802_v37, %v3134_v7  ;;  %v3151_v11 = vmul.f32 %v3804_v39, %v3135_v22  ;;  %v3152_v34 = vmul.f32 %v3806_v43, %v3136_v23  ;;  %v3153_v10 = vmul.f32 %v3808_v44, %v3137_v61 }
 0x800   : > { %v3154_v3 = vmul.f32 %v3810_v46, %v3138_v29  ;;  %v3155_v13 = vmul.f32 %v3812_v49, %v3139_v6  ;;  %v3156_v14 = vmul.f32 %v3814_v54, %v3140_v30 }
 0x801   : > { %v3170_v40 = vrot.slane %v3150_v8, 7  ;;  %v3172_v9 = vrot.slane %v3151_v11, 6  ;;  %v3174_v15 = vrot.slane %v3152_v34, 5  ;;  %v3176_v18 = vrot.slane %v3153_v10, 4 }
 0x802   : > { %v3178_v24 = vrot.slane %v3154_v3, 3  ;;  %v3180_v51 = vrot.slane %v3155_v13, 2  ;;  %v3182_v27 = vrot.slane %v3156_v14, 1 }
 0x803   : > { %v3171_v16 = vsel %vm3042_vm9, %v3170_v40, %v3149_v12 }
 0x804   : > { %v3173_v17 = vsel %vm3045_vm10, %v3172_v9, %v3171_v16 }
 0x805   : > { %v3175_v19 = vsel %vm3048_vm11, %v3174_v15, %v3173_v17 }
 0x806   : > { %v3177_v25 = vsel %vm3051_vm12, %v3176_v18, %v3175_v19 }
 0x807   : > { %v3179_v26 = vsel %vm3054_vm13, %v3178_v24, %v3177_v25 }
 0x808   : > { %v3181_v28 = vsel %vm3057_vm14, %v3180_v51, %v3179_v26 }
 0x809   : > { %v3183_v55 = vsel %vm3060_vm15, %v3182_v27, %v3181_v28 }
 0x80a   : > { %3675 = vmatmul.mubr.msk.f32.vlgmr.msra.gmra.mrb[32].mxu0 %vm281_vm0, %v3183_v55 }
 0x8dd   : > { %v3255_v31 = vpop.f32.mrb[32].mxu0 }
 0x8de   : > { %3259 = vst [vmem:[%s241_s11] sm:$0xff] %v3255_v31  ;;  %v3676_v32 = vpop.f32.mrb[33].mxu0 }
 0x8df   : > { %3890 = shalt.err (!%p3887_p11)
}
 0x8e0   : > { %s3891_s8 = scalar_lea.hbm %s4517_s28, 128  ;;  %s3895_s27 = scalar_lea.hbm %s4561_s3, 512 }
 0x8e1   : > { %p3892_p8 = scmp.ne.s32.totalorder %s4517_s28, %s3891_s8  ;;  %p3896_p3 = scmp.lt.u32.totalorder %s4517_s28, %s4561_s3 }
 0x8e2   : > { %p3897_p6 = scmp.lt.u32.totalorder %s3895_s27, %s3891_s8  ;;  %p3899_p0 = scmp.lt.u32.totalorder %s3891_s8, %s4517_s28 }
 0x8e3   : > { %p3893_p13 = pnand %p3892_p8, %p4571_p10 }
 0x8e4   : > { %p3898_p12 = por %p3897_p6, %p3896_p3 }
 0x8e5   : > { %p3894_p1 = pneg %p3893_p13 }
 0x8e6   : > { %p3900_p9 = por %p3899_p0, %p3898_p12 }
 0x8e8   : > { %p3901_p4 = pnand %p3900_p9, %p3894_p1 }
 0x8ea   : > { %3904 = shalt.err (!%p3901_p4)
}
 0x8eb   : > { %3681 = dma.vmem_to_hbm [thread:$0]  (%p4571_p10), %s4512_s17, 128, %s4517_s28, %s3261_s29  }
 0x8ec PF: > { %p3695_p5 = scmp.ge.s32.totalorder %s3947_s15, 2  ;;  %s3286_s9 = sand.u32 1, %s3935_s12  }
 0x8ed   : > { %p4572_p2 = scmp.ne.s32.totalorder %s4567_s25, 0  ;;  %s3287_s23 = scalar_lea.sflag [#allocation4], %s3286_s9 }
 0x8ef   : > { %p3691_p7 = pnand %p3695_p5, %p4572_p2 }
 0x8f1   : > { %3930 = dma.done.wait (!%p3691_p7), %s3287_s23, 128  }
 0x8f2   : > { %3932 = vsyncadd (!%p3691_p7), %s3287_s23, 4294967168  ;;  %p19_p11 = scmp.ge.s32.totalorder %s4004_s18, 6   ;;  %s4573_s12 = smov %s3939_s13 }
 0x8f3   : > { %s4574_s13 = smov %s3943_s14  ;;  %s4575_s14 = smov %s4016_s21 }
 0x8f4   : > { %s4576_s15 = smov %s4004_s18  ;;  %21 = sbr.rel (!%p19_p11) target bundleno = 7 (0x7), region = 93 }
 0x8fb   :  { %3292 = vsyncpa [#allocation3], 1 }
 0x8fc   :  { %3294 = vsyncpa [#allocation3 + $0x1], 1 }
 0x8fd   :  { %3295 = vsyncpa [#allocation6], 1 }
 0x8fe   :  { %3297 = vsyncpa [#allocation6 + $0x1], 1 }
 0x8ff   :  { %3298 = vsyncpa [#allocation4], 1 }
 0x900   :  { %3300 = vsyncpa [#allocation4 + $0x1], 1 }

</bundles_post_ra>
